<compile_context>
chip_gen: v7x
topology: tpu7x:2x2x1
jax: 0.10.0
libtpu: 0.0.40
codegen_flags: <defaults>
</compile_context>

<pallas_src>
import jax
import jax.numpy as jnp
from jax.experimental import pallas as pl
from jax.experimental.pallas import tpu as pltpu

LANE = 128
SUBLANE_BF16 = 16          # bf16 packs 16 rows per vreg
TM_MAX = 1024              # max batch rows per grid step


def _round_up(n, m):
    return ((n + m - 1) // m) * m


def mlp_kernel(x_ref, w1_ref, b1_ref, w2_ref, b2_ref, w3_ref, b3_ref,
               w4_ref, b4_ref, o_ref):
    """Fused 4-layer MLP: bf16 MXU matmuls, f32 accumulation / bias / ReLU."""
    # Layer 1: (TM, 784) @ (784, 512)   (K=784 unpadded; Mosaic masks remainder)
    h = jnp.dot(x_ref[...], w1_ref[...], preferred_element_type=jnp.float32)
    h = jnp.maximum(h + b1_ref[...], 0.0)
    # Layer 2: (TM, 512) @ (512, 256)
    h = jnp.dot(h.astype(jnp.bfloat16), w2_ref[...],
                preferred_element_type=jnp.float32)
    h = jnp.maximum(h + b2_ref[...], 0.0)
    # Layer 3: (TM, 256) @ (256, 128)
    h = jnp.dot(h.astype(jnp.bfloat16), w3_ref[...],
                preferred_element_type=jnp.float32)
    h = jnp.maximum(h + b3_ref[...], 0.0)
    # Layer 4 (logits, N padded 10 -> 128 for lane-dense stores): (TM, 128) @ (128, 128)
    h = jnp.dot(h.astype(jnp.bfloat16), w4_ref[...],
                preferred_element_type=jnp.float32)
    o_ref[...] = (h + b4_ref[...]).astype(o_ref.dtype)
    # Dropout(0.3) layers: identity in eval mode.


def init_mlp_params(key, input_size=784, hidden_sizes=(512, 256, 128),
                    num_classes=10):
    """f32 params mirroring nn.Linear's U(-1/sqrt(fan_in), 1/sqrt(fan_in)).

    Weights are stored as (in_features, out_features) == PyTorch weight.T.
    """
    sizes = [input_size, *hidden_sizes, num_classes]
    params = []
    for fan_in, fan_out in zip(sizes[:-1], sizes[1:]):
        key, kw, kb = jax.random.split(key, 3)
        bound = 1.0 / (fan_in ** 0.5)
        w = jax.random.uniform(kw, (fan_in, fan_out), jnp.float32, -bound, bound)
        b = jax.random.uniform(kb, (fan_out,), jnp.float32, -bound, bound)
        params.append((w, b))
    return params


def pack_params(params):
    """Pad only out-features to a lane multiple (10 -> 128); weights -> bf16.

    In-features are left unpadded (784 is a sublane multiple; 512/256/128 are
    already lane multiples), so no padded HBM copy of x is ever needed.
    """
    packed = []
    for w, b in params:
        kin, kout = w.shape
        kout_p = _round_up(kout, LANE)
        w_p = jnp.zeros((kin, kout_p), jnp.bfloat16)
        w_p = w_p.at[:, :kout].set(w.astype(jnp.bfloat16))
        b_p = jnp.zeros((1, kout_p), jnp.float32).at[0, :kout].set(b)
        packed.append((w_p, b_p))
    return packed


def _choose_batch_tile(B):
    """Pick (TM, B_pad): rows per grid step and padded batch size."""
    B16 = _round_up(max(B, 1), SUBLANE_BF16)
    if B16 <= 2 * SUBLANE_BF16:          # tiny batch: a single small step
        return B16, B16
    # >= 2 steps (v7x dual TensorCore), TM <= 1024, minimal batch padding.
    n_steps = max(2, pl.cdiv(B16, TM_MAX))
    tm = _round_up(pl.cdiv(B16, n_steps), SUBLANE_BF16)
    return tm, _round_up(B16, tm)


def mlp_forward(x_nchw, packed_params, num_classes=10):
    """Fused forward pass.  x_nchw: (B, C, H, W) -> logits (B, num_classes)."""
    B = x_nchw.shape[0]
    x = x_nchw.reshape(B, -1)                       # torch .view(B, -1) order
    K = x.shape[1]                                  # 784, kept unpadded
    N_pad = packed_params[-1][0].shape[1]           # 128

    TM, B_pad = _choose_batch_tile(B)
    x_bf16 = x.astype(jnp.bfloat16)
    if B_pad != B:
        x_bf16 = jnp.pad(x_bf16, ((0, B_pad - B), (0, 0)))

    in_specs = [pl.BlockSpec((TM, K), lambda i: (i, 0))]
    args = [x_bf16]
    for w_p, b_p in packed_params:
        kin, kout_p = w_p.shape
        # Constant index_maps -> weights/biases stay VMEM-resident across steps.
        in_specs.append(pl.BlockSpec((kin, kout_p), lambda i: (0, 0)))
        in_specs.append(pl.BlockSpec((1, kout_p), lambda i: (0, 0)))
        args.extend([w_p, b_p])

    flops = 2 * B_pad * sum(w.shape[0] * w.shape[1] for w, _ in packed_params)
    bytes_accessed = (
        x_bf16.size * 2
        + sum(w.size * 2 + b.size * 4 for w, b in packed_params)
        + B_pad * N_pad * 2
    )

    out_padded = pl.pallas_call(
        mlp_kernel,
        out_shape=jax.ShapeDtypeStruct((B_pad, N_pad), jnp.bfloat16),
        grid=(B_pad // TM,),
        in_specs=in_specs,
        out_specs=pl.BlockSpec((TM, N_pad), lambda i: (i, 0)),
        compiler_params=pltpu.CompilerParams(
            dimension_semantics=("parallel",),
            vmem_limit_bytes=32 * 1024 * 1024,
        ),
        cost_estimate=pl.CostEstimate(
            flops=flops, transcendentals=0, bytes_accessed=bytes_accessed),
    )(*args)
    return out_padded[:B, :num_classes].astype(jnp.float32)


if __name__ == "__main__":
    key = jax.random.PRNGKey(0)
    k_params, k_x = jax.random.split(key)

    # MNIST-like input consistent with input_size=784: (B=2, C=1, H=28, W=28)
    x = jax.random.normal(k_x, (2, 1, 28, 28), jnp.float32)

    params_f32 = init_mlp_params(k_params)
    packed = pack_params(params_f32)

    out = mlp_forward(x, packed)
    out = jax.block_until_ready(out)
    assert out.shape == (2, 10), out.shape

    # Reference: same bf16-weight / f32-accumulate / bf16-store math in plain JAX.
    ref = x.reshape(2, -1)
    for i, (w, b) in enumerate(params_f32):
        ref = jnp.dot(ref.astype(jnp.bfloat16), w.astype(jnp.bfloat16),
                      preferred_element_type=jnp.float32) + b
        if i != len(params_f32) - 1:
            ref = jnp.maximum(ref, 0.0)
    ref = ref.astype(jnp.bfloat16).astype(jnp.float32)
    assert jnp.allclose(out, ref, atol=2e-2, rtol=2e-2), (
        jnp.max(jnp.abs(out - ref)))

    print("KERNEL_OK")
</pallas_src>

<mosaic_0001>
module attributes {stable_mosaic.version = 11 : i64} {
  func.func @mlp_kernel(%arg0: i32, %arg1: memref<16x784xbf16, #tpu.memory_space<vmem>>, %arg2: memref<784x512xbf16, #tpu.memory_space<vmem>>, %arg3: memref<1x512xf32, #tpu.memory_space<vmem>>, %arg4: memref<512x256xbf16, #tpu.memory_space<vmem>>, %arg5: memref<1x256xf32, #tpu.memory_space<vmem>>, %arg6: memref<256x128xbf16, #tpu.memory_space<vmem>>, %arg7: memref<1x128xf32, #tpu.memory_space<vmem>>, %arg8: memref<128x128xbf16, #tpu.memory_space<vmem>>, %arg9: memref<1x128xf32, #tpu.memory_space<vmem>>, %arg10: memref<16x128xbf16, #tpu.memory_space<vmem>>) attributes {dimension_semantics = [#tpu.dimension_semantics<parallel>], iteration_bounds = array<i64: 1>, scalar_prefetch = 0 : i64, scratch_operands = 0 : i64, tpu.core_type = #tpu.core_type<tc>, window_params = [{transform_indices = @transform_0, window_bounds = array<i64: 16, 784>}, {pipeline_mode = #tpu.pipeline_mode<synchronous>, transform_indices = @transform_1, window_bounds = array<i64: 784, 512>}, {pipeline_mode = #tpu.pipeline_mode<synchronous>, transform_indices = @transform_2, window_bounds = array<i64: 1, 512>}, {pipeline_mode = #tpu.pipeline_mode<synchronous>, transform_indices = @transform_3, window_bounds = array<i64: 512, 256>}, {pipeline_mode = #tpu.pipeline_mode<synchronous>, transform_indices = @transform_4, window_bounds = array<i64: 1, 256>}, {pipeline_mode = #tpu.pipeline_mode<synchronous>, transform_indices = @transform_5, window_bounds = array<i64: 256, 128>}, {pipeline_mode = #tpu.pipeline_mode<synchronous>, transform_indices = @transform_6, window_bounds = array<i64: 1, 128>}, {pipeline_mode = #tpu.pipeline_mode<synchronous>, transform_indices = @transform_7, window_bounds = array<i64: 128, 128>}, {pipeline_mode = #tpu.pipeline_mode<synchronous>, transform_indices = @transform_8, window_bounds = array<i64: 1, 128>}, {transform_indices = @transform_9, window_bounds = array<i64: 16, 128>}]} {
    %c0 = arith.constant 0 : index
    %c0_0 = arith.constant 0 : index
    %0 = vector.load %arg1[%c0, %c0_0] : memref<16x784xbf16, #tpu.memory_space<vmem>>, vector<16x784xbf16>
    %c0_1 = arith.constant 0 : index
    %c0_2 = arith.constant 0 : index
    %1 = vector.load %arg2[%c0_1, %c0_2] : memref<784x512xbf16, #tpu.memory_space<vmem>>, vector<784x512xbf16>
    %cst = arith.constant dense<0.000000e+00> : vector<16x512xf32>
    %2 = tpu.matmul %0, %1, %cst {dimension_numbers = #tpu.dot_dimension_numbers<[1], [0], [0], [1], [0, 0, 1, 1], [], []>} : vector<16x784xbf16>, vector<784x512xbf16>, vector<16x512xf32> -> vector<16x512xf32>
    %c0_3 = arith.constant 0 : index
    %c0_4 = arith.constant 0 : index
    %3 = vector.load %arg3[%c0_3, %c0_4] : memref<1x512xf32, #tpu.memory_space<vmem>>, vector<1x512xf32>
    %4 = vector.broadcast %3 : vector<1x512xf32> to vector<16x512xf32>
    %5 = arith.addf %2, %4 : vector<16x512xf32>
    %cst_5 = arith.constant 0.000000e+00 : f32
    %6 = vector.broadcast %cst_5 : f32 to vector<16x512xf32>
    %7 = arith.maximumf %5, %6 : vector<16x512xf32>
    %8 = arith.truncf %7 : vector<16x512xf32> to vector<16x512xbf16>
    %c0_6 = arith.constant 0 : index
    %c0_7 = arith.constant 0 : index
    %9 = vector.load %arg4[%c0_6, %c0_7] : memref<512x256xbf16, #tpu.memory_space<vmem>>, vector<512x256xbf16>
    %cst_8 = arith.constant dense<0.000000e+00> : vector<16x256xf32>
    %10 = tpu.matmul %8, %9, %cst_8 {dimension_numbers = #tpu.dot_dimension_numbers<[1], [0], [0], [1], [0, 0, 1, 1], [], []>} : vector<16x512xbf16>, vector<512x256xbf16>, vector<16x256xf32> -> vector<16x256xf32>
    %c0_9 = arith.constant 0 : index
    %c0_10 = arith.constant 0 : index
    %11 = vector.load %arg5[%c0_9, %c0_10] : memref<1x256xf32, #tpu.memory_space<vmem>>, vector<1x256xf32>
    %12 = vector.broadcast %11 : vector<1x256xf32> to vector<16x256xf32>
    %13 = arith.addf %10, %12 : vector<16x256xf32>
    %cst_11 = arith.constant 0.000000e+00 : f32
    %14 = vector.broadcast %cst_11 : f32 to vector<16x256xf32>
    %15 = arith.maximumf %13, %14 : vector<16x256xf32>
    %16 = arith.truncf %15 : vector<16x256xf32> to vector<16x256xbf16>
    %c0_12 = arith.constant 0 : index
    %c0_13 = arith.constant 0 : index
    %17 = vector.load %arg6[%c0_12, %c0_13] : memref<256x128xbf16, #tpu.memory_space<vmem>>, vector<256x128xbf16>
    %cst_14 = arith.constant dense<0.000000e+00> : vector<16x128xf32>
    %18 = tpu.matmul %16, %17, %cst_14 {dimension_numbers = #tpu.dot_dimension_numbers<[1], [0], [0], [1], [0, 0, 1, 1], [], []>} : vector<16x256xbf16>, vector<256x128xbf16>, vector<16x128xf32> -> vector<16x128xf32>
    %c0_15 = arith.constant 0 : index
    %c0_16 = arith.constant 0 : index
    %19 = vector.load %arg7[%c0_15, %c0_16] : memref<1x128xf32, #tpu.memory_space<vmem>>, vector<1x128xf32>
    %20 = vector.broadcast %19 : vector<1x128xf32> to vector<16x128xf32>
    %21 = arith.addf %18, %20 : vector<16x128xf32>
    %cst_17 = arith.constant 0.000000e+00 : f32
    %22 = vector.broadcast %cst_17 : f32 to vector<16x128xf32>
    %23 = arith.maximumf %21, %22 : vector<16x128xf32>
    %24 = arith.truncf %23 : vector<16x128xf32> to vector<16x128xbf16>
    %c0_18 = arith.constant 0 : index
    %c0_19 = arith.constant 0 : index
    %25 = vector.load %arg8[%c0_18, %c0_19] : memref<128x128xbf16, #tpu.memory_space<vmem>>, vector<128x128xbf16>
    %cst_20 = arith.constant dense<0.000000e+00> : vector<16x128xf32>
    %26 = tpu.matmul %24, %25, %cst_20 {dimension_numbers = #tpu.dot_dimension_numbers<[1], [0], [0], [1], [0, 0, 1, 1], [], []>} : vector<16x128xbf16>, vector<128x128xbf16>, vector<16x128xf32> -> vector<16x128xf32>
    %c0_21 = arith.constant 0 : index
    %c0_22 = arith.constant 0 : index
    %27 = vector.load %arg9[%c0_21, %c0_22] : memref<1x128xf32, #tpu.memory_space<vmem>>, vector<1x128xf32>
    %28 = vector.broadcast %27 : vector<1x128xf32> to vector<16x128xf32>
    %29 = arith.addf %26, %28 : vector<16x128xf32>
    %30 = arith.truncf %29 : vector<16x128xf32> to vector<16x128xbf16>
    %c0_23 = arith.constant 0 : index
    %c0_24 = arith.constant 0 : index
    %31 = vector.load %arg10[%c0_23, %c0_24] : memref<16x128xbf16, #tpu.memory_space<vmem>>, vector<16x128xbf16>
    tpu.vector_store %arg10[%c0_23, %c0_24], %30 {strides = array<i32>} : memref<16x128xbf16, #tpu.memory_space<vmem>>, vector<16x128xbf16>,
    return
  }
  func.func @transform_0(%arg0: i32) -> (i32, i32) {
    %c0_i32 = arith.constant 0 : i32
    %c0_i32_0 = arith.constant 0 : i32
    return %arg0, %c0_i32 : i32, i32
  }
  func.func @transform_1(%arg0: i32) -> (i32, i32) {
    %c0_i32 = arith.constant 0 : i32
    %c0_i32_0 = arith.constant 0 : i32
    %c0_i32_1 = arith.constant 0 : i32
    return %c0_i32, %c0_i32_0 : i32, i32
  }
  func.func @transform_2(%arg0: i32) -> (i32, i32) {
    %c0_i32 = arith.constant 0 : i32
    %c0_i32_0 = arith.constant 0 : i32
    %c0_i32_1 = arith.constant 0 : i32
    return %c0_i32, %c0_i32_0 : i32, i32
  }
  func.func @transform_3(%arg0: i32) -> (i32, i32) {
    %c0_i32 = arith.constant 0 : i32
    %c0_i32_0 = arith.constant 0 : i32
    %c0_i32_1 = arith.constant 0 : i32
    return %c0_i32, %c0_i32_0 : i32, i32
  }
  func.func @transform_4(%arg0: i32) -> (i32, i32) {
    %c0_i32 = arith.constant 0 : i32
    %c0_i32_0 = arith.constant 0 : i32
    %c0_i32_1 = arith.constant 0 : i32
    return %c0_i32, %c0_i32_0 : i32, i32
  }
  func.func @transform_5(%arg0: i32) -> (i32, i32) {
    %c0_i32 = arith.constant 0 : i32
    %c0_i32_0 = arith.constant 0 : i32
    %c0_i32_1 = arith.constant 0 : i32
    return %c0_i32, %c0_i32_0 : i32, i32
  }
  func.func @transform_6(%arg0: i32) -> (i32, i32) {
    %c0_i32 = arith.constant 0 : i32
    %c0_i32_0 = arith.constant 0 : i32
    %c0_i32_1 = arith.constant 0 : i32
    return %c0_i32, %c0_i32_0 : i32, i32
  }
  func.func @transform_7(%arg0: i32) -> (i32, i32) {
    %c0_i32 = arith.constant 0 : i32
    %c0_i32_0 = arith.constant 0 : i32
    %c0_i32_1 = arith.constant 0 : i32
    return %c0_i32, %c0_i32_0 : i32, i32
  }
  func.func @transform_8(%arg0: i32) -> (i32, i32) {
    %c0_i32 = arith.constant 0 : i32
    %c0_i32_0 = arith.constant 0 : i32
    %c0_i32_1 = arith.constant 0 : i32
    return %c0_i32, %c0_i32_0 : i32, i32
  }
  func.func @transform_9(%arg0: i32) -> (i32, i32) {
    %c0_i32 = arith.constant 0 : i32
    %c0_i32_0 = arith.constant 0 : i32
    return %arg0, %c0_i32 : i32, i32
  }
}

</mosaic_0001>

<bundles_post_ra>
// kernel: tpu_custom_call.1
= control target key start
LH: loop header
LB: loop body
LE: loop exit
PB: predicated region body
PF: predicated region fallthrough
CT: control target
= control target key end

     0   :  { %14 = vsyncpa [#allocation3], 0  ;;  %s3678_s0 = inlined_call_operand.hbm [shape: bf16[16,784], index: 0, kind: input, shape index: {}]   ;;  %s3679_s1 = inlined_call_operand.hbm [shape: bf16[784,512], index: 1, kind: input, shape index: {}]   ;;  %s3680_s2 = inlined_call_operand.vmem [shape: f32[1,512], index: 2, kind: input, shape index: {}]   ;;  %s3681_s3 = inlined_call_operand.hbm [shape: bf16[512,256], index: 3, kind: input, shape index: {}]   ;;  %s3682_s4 = inlined_call_operand.vmem [shape: f32[1,256], index: 4, kind: input, shape index: {}]   ;;  %s3683_s5 = inlined_call_operand.hbm [shape: bf16[256,128], index: 5, kind: input, shape index: {}]   ;;  %s3684_s6 = inlined_call_operand.vmem [shape: f32[1,128], index: 6, kind: input, shape index: {}]   ;;  %s3685_s7 = inlined_call_operand.hbm [shape: bf16[128,128], index: 7, kind: input, shape index: {}]   ;;  %s3686_s8 = inlined_call_operand.vmem [shape: f32[1,128], index: 8, kind: input, shape index: {}]   ;;  %s3687_s9 = inlined_call_operand.hbm [shape: bf16[16,128], index: 9, kind: output, shape index: {}]  }
   0x1   :  { %15 = vsyncpa [#allocation6], 0 }
   0x2   :  { %16 = vsyncpa [#allocation9], 0 }
   0x3   :  { %17 = vsyncpa [#allocation4], 0  ;;  %s3488_s30 = smov [#allocation5]   ;;  %s3348_s13 = scalar_lea.hbm %s3679_s1, 25088 }
   0x4   :  { %s35_s10 = sshll.u32 %s3488_s30, 4  ;;  %p3349_p0 = scmp.ne.s32.totalorder %s3679_s1, %s3348_s13  ;;  %s36_s10 = int_to_ptr.vmem [resolvable:$true] %s35_s10 }
   0x5   :  { %p3352_p1 = scmp.lt.u32.totalorder %s3348_s13, %s3679_s1 }
   0x7   :  { %p3354_p2 = pnand %p3352_p1, %p3349_p0 }
   0x9   :  { %3357 = shalt.err (!%p3354_p2)
}
   0xa   :  { %s3358_s18 = scalar_lea.vmem %s36_s10, 25088  ;;  %p3363_p4 = scmp.lt.s32.totalorder %s36_s10, %s36_s10 }
   0xb   :  { %p3359_p3 = scmp.ne.s32.totalorder %s36_s10, %s3358_s18  ;;  %p3364_p5 = scmp.lt.s32.totalorder %s3358_s18, %s3358_s18 }
   0xd   :  { %p3365_p6 = por %p3364_p5, %p3363_p4 }
   0xf   :  { %p3366_p7 = pnand %p3365_p6, %p3359_p3 }
  0x11   :  { %3369 = shalt.err (!%p3366_p7)
}
  0x12   :  { %s3489_s19 = smov 256   ;;  %s3490_s20 = smov 16  }
  0x13   :  { %41 = dma.hbm_to_vmem [thread:$0]  %s3679_s1, 25088, %s36_s10, [#allocation6], %s3489_s19, %s3489_s19, %s3490_s20  }
  0x14   :  { %s3491_s23 = smov [#allocation8]   ;;  %s3370_s27 = scalar_lea.hbm %s3683_s5, 2048 }
  0x15   :  { %s63_s24 = sshll.u32 %s3491_s23, 4  ;;  %p3371_p8 = scmp.ne.s32.totalorder %s3683_s5, %s3370_s27  ;;  %s64_s24 = int_to_ptr.vmem [resolvable:$true] %s63_s24 }
  0x16   :  { %p3374_p9 = scmp.lt.u32.totalorder %s3370_s27, %s3683_s5 }
  0x18   :  { %p3376_p10 = pnand %p3374_p9, %p3371_p8 }
  0x1a   :  { %3379 = shalt.err (!%p3376_p10)
}
  0x1b   :  { %s3380_s12 = scalar_lea.vmem %s64_s24, 2048  ;;  %p3385_p12 = scmp.lt.s32.totalorder %s64_s24, %s64_s24 }
  0x1c   :  { %p3381_p11 = scmp.ne.s32.totalorder %s64_s24, %s3380_s12  ;;  %p3386_p13 = scmp.lt.s32.totalorder %s3380_s12, %s3380_s12 }
  0x1e   :  { %p3387_p0 = por %p3386_p13, %p3385_p12 }
  0x20   :  { %p3388_p1 = pnand %p3387_p0, %p3381_p11 }
  0x22   :  { %3391 = shalt.err (!%p3388_p1)
}
  0x23   :  { %s3492_s1 = smov 64   ;;  %s3493_s10 = smov 4  }
  0x24   :  { %69 = dma.hbm_to_vmem [thread:$0]  %s3683_s5, 2048, %s64_s24, [#allocation9], %s3492_s1, %s3492_s1, %s3493_s10  }
  0x25   :  { %s3494_s15 = smov [#allocation2]   ;;  %s3392_s19 = scalar_lea.hbm %s3678_s0, 896 }
  0x26   :  { %s23_s16 = sshll.u32 %s3494_s15, 4  ;;  %p3393_p2 = scmp.ne.s32.totalorder %s3678_s0, %s3392_s19  ;;  %s24_s16 = int_to_ptr.vmem [resolvable:$true] %s23_s16 }
  0x27   :  { %p3396_p3 = scmp.lt.u32.totalorder %s3392_s19, %s3678_s0 }
  0x29   :  { %p3398_p4 = pnand %p3396_p3, %p3393_p2 }
  0x2b   :  { %3401 = shalt.err (!%p3398_p4)
}
  0x2c   :  { %s3402_s25 = scalar_lea.vmem %s24_s16, 896  ;;  %p3407_p6 = scmp.lt.s32.totalorder %s24_s16, %s24_s16 }
  0x2d   :  { %p3403_p5 = scmp.ne.s32.totalorder %s24_s16, %s3402_s25  ;;  %p3408_p7 = scmp.lt.s32.totalorder %s3402_s25, %s3402_s25 }
  0x2f   :  { %p3409_p8 = por %p3408_p7, %p3407_p6 }
  0x31   :  { %p3410_p9 = pnand %p3409_p8, %p3403_p5 }
  0x33   :  { %3413 = shalt.err (!%p3410_p9)
}
  0x34   :  { %s3495_s5 = smov 448   ;;  %s3496_s24 = smov 28  }
  0x35   :  { %29 = dma.hbm_to_vmem [thread:$0]  %s3678_s0, 896, %s24_s16, [#allocation3], %s3495_s5, %s3495_s5, %s3496_s24  }
  0x36   :  { %s3497_s28 = smov [#allocation7]   ;;  %s3414_s12 = scalar_lea.hbm %s3681_s3, 8192 }
  0x37   :  { %s49_s29 = sshll.u32 %s3497_s28, 4  ;;  %p3415_p10 = scmp.ne.s32.totalorder %s3681_s3, %s3414_s12  ;;  %s50_s29 = int_to_ptr.vmem [resolvable:$true] %s49_s29 }
  0x38   :  { %p3418_p11 = scmp.lt.u32.totalorder %s3414_s12, %s3681_s3 }
  0x3a   :  { %p3420_p12 = pnand %p3418_p11, %p3415_p10 }
  0x3c   :  { %3423 = shalt.err (!%p3420_p12)
}
  0x3d   :  { %s3424_s18 = scalar_lea.vmem %s50_s29, 8192  ;;  %p3429_p0 = scmp.lt.s32.totalorder %s50_s29, %s50_s29 }
  0x3e   :  { %p3425_p13 = scmp.ne.s32.totalorder %s50_s29, %s3424_s18  ;;  %p3430_p1 = scmp.lt.s32.totalorder %s3424_s18, %s3424_s18 }
  0x40   :  { %p3431_p2 = por %p3430_p1, %p3429_p0 }
  0x42   :  { %p3432_p3 = pnand %p3431_p2, %p3425_p13 }
  0x44   :  { %3435 = shalt.err (!%p3432_p3)
}
  0x45   :  { %s3498_s0 = smov 128   ;;  %s3499_s16 = smov 8  }
  0x46   :  { %55 = dma.hbm_to_vmem [thread:$0]  %s3681_s3, 8192, %s50_s29, [#allocation6], %s3498_s0, %s3498_s0, %s3499_s16  }
  0x47   :  { %s3500_s21 = smov [#allocation10]   ;;  %s3436_s5 = scalar_lea.hbm %s3685_s7, 1024 }
  0x48   :  { %s77_s22 = sshll.u32 %s3500_s21, 4  ;;  %p3437_p4 = scmp.ne.s32.totalorder %s3685_s7, %s3436_s5  ;;  %s78_s22 = int_to_ptr.vmem [resolvable:$true] %s77_s22 }
  0x49   :  { %p3440_p5 = scmp.lt.u32.totalorder %s3436_s5, %s3685_s7 }
  0x4b   :  { %p3442_p6 = pnand %p3440_p5, %p3437_p4 }
  0x4d   :  { %3445 = shalt.err (!%p3442_p6)
}
  0x4e   :  { %s3446_s30 = scalar_lea.vmem %s78_s22, 1024  ;;  %p3451_p8 = scmp.lt.s32.totalorder %s78_s22, %s78_s22 }
  0x4f   :  { %p3447_p7 = scmp.ne.s32.totalorder %s78_s22, %s3446_s30  ;;  %p3452_p9 = scmp.lt.s32.totalorder %s3446_s30, %s3446_s30 }
  0x51   :  { %p3453_p10 = por %p3452_p9, %p3451_p8 }
  0x53   :  { %p3454_p11 = pnand %p3453_p10, %p3447_p7 }
  0x55   :  { %3457 = shalt.err (!%p3454_p11)
}
  0x56   :  { %83 = dma.hbm_to_vmem [thread:$0]  %s3685_s7, 1024, %s78_s22, [#allocation9], %s3492_s1, %s3492_s1, %s3493_s10  }
  0x57   :  { %3480 = dma.done.wait [#allocation3], 896  }
  0x58   :  { %3481 = vsyncadd [#allocation3], 4294966400 }
  0x59   :  { %3482 = dma.done.wait [#allocation6], 33280  }
  0x5a   :  { %3483 = vsyncadd [#allocation6], 4294934016 }
  0x5b   :  { %3484 = dma.done.wait [#allocation9], 3072  }
  0x5c   :  { %3485 = vsyncadd [#allocation9], 4294964224  ;;  %v3501_v0 = vmov 0   ;;  %v2923_v1 = vld [vmem:[#allocation5 + $0x4] ss:$16 sps:$4 sm:$0xff]   ;;  %vm1343_vm0 = vcmask 130048  }
  0x5d   :  { %1508 = vmatprep.mubr.bf16.mxu1 %v3501_v0  ;;  %v2925_v2 = vld [vmem:[#allocation5 + $0x604] ss:$16 sps:$4 sm:$0xff]   ;;  %1347 = vmatprep.subr.bf16.mxu0 %v2923_v1  ;;  %v2927_v3 = vld [vmem:[#allocation5] ss:$16 sps:$4 sm:$0xff]   ;;  %v2931_v6 = vld [vmem:[#allocation5 + $0x8] ss:$16 sps:$4 sm:$0xff]  }
  0x5e   :  { %v2928_v4 = vld [vmem:[#allocation5 + $0x600] ss:$16 sps:$4 sm:$0xff]   ;;  %1476 = vmatprep.subr.bf16.mxu1 %v2925_v2  ;;  %v2929_v5 = vld [vmem:[#allocation5 + $0x24] ss:$16 sps:$4 sm:$0xff]   ;;  %1348 = vmatpush1.bf16.msra.mxu0 %v2927_v3  ;;  %v2933_v7 = vld [vmem:[#allocation5 + $0xc] ss:$16 sps:$4 sm:$0xff]  }
  0x5f   :  { %1477 = vmatpush1.bf16.msra.mxu1 %v2928_v4  ;;  %1349 = vmatprep.subr.bf16.mxu0 %v2929_v5  ;;  %v2934_v8 = vld [vmem:[#allocation5 + $0x20] ss:$16 sps:$4 sm:$0xff]   ;;  %v2936_v10 = vld [vmem:[#allocation5 + $0x44] ss:$16 sps:$4 sm:$0xff]   ;;  %v2938_v11 = vld [vmem:[#allocation5 + $0x28] ss:$16 sps:$4 sm:$0xff]  }
  0x60   :  { %1519 = vmatprep.subr.bf16.mxu1 %v2933_v7  ;;  %v2935_v9 = vld [vmem:[#allocation2 + $0x18] ss:$28 sps:$4 sm:$0xff]   ;;  %v2942_v14 = vld [vmem:[#allocation5 + $0x64] ss:$16 sps:$4 sm:$0xff]   ;;  %v2944_v17 = vld [vmem:[#allocation5 + $0x48] ss:$16 sps:$4 sm:$0xff]  }
  0x61   :  { %v2940_v12 = vld [vmem:[#allocation5 + $0x2c] ss:$16 sps:$4 sm:$0xff]   ;;  %v2941_v13 = vld [vmem:[#allocation5 + $0x40] ss:$16 sps:$4 sm:$0xff]   ;;  %v2948_v18 = vld [vmem:[#allocation5 + $0x84] ss:$16 sps:$4 sm:$0xff]  }
  0x62   :  { %1350 = vmatpush1.bf16.msra.mxu0 %v2934_v8  ;;  %2714 = vmatmul.mubr.msk.bf16.vlgmr.msra.gmra.mrb[0].mxu1 %vm1343_vm0, %v2935_v9  ;;  %v2946_v15 = vld [vmem:[#allocation5 + $0x4c] ss:$16 sps:$4 sm:$0xff]   ;;  %v2947_v16 = vld [vmem:[#allocation5 + $0x60] ss:$16 sps:$4 sm:$0xff]   ;;  %v2950_v20 = vld [vmem:[#allocation5 + $0x68] ss:$16 sps:$4 sm:$0xff]  }
  0x63   :  { %1520 = vmatpush1.bf16.msra.mxu1 %v2931_v6  ;;  %1351 = vmatprep.subr.bf16.mxu0 %v2936_v10  ;;  %v2952_v19 = vld [vmem:[#allocation5 + $0x6c] ss:$16 sps:$4 sm:$0xff]   ;;  %v2953_v21 = vld [vmem:[#allocation5 + $0x80] ss:$16 sps:$4 sm:$0xff]   ;;  %v2954_v22 = vld [vmem:[#allocation5 + $0xa4] ss:$16 sps:$4 sm:$0xff]  }
  0x64   :  { %1521 = vmatprep.subr.bf16.mxu1 %v2940_v12  ;;  %v2958_v23 = vld [vmem:[#allocation5 + $0x8c] ss:$16 sps:$4 sm:$0xff]   ;;  %v2959_v24 = vld [vmem:[#allocation5 + $0xa0] ss:$16 sps:$4 sm:$0xff]   ;;  %v2956_v25 = vld [vmem:[#allocation5 + $0x88] ss:$16 sps:$4 sm:$0xff]  }
  0x65   :  { %v2960_v26 = vld [vmem:[#allocation5 + $0xc4] ss:$16 sps:$4 sm:$0xff]   ;;  %v2964_v27 = vld [vmem:[#allocation5 + $0xac] ss:$16 sps:$4 sm:$0xff]   ;;  %v2962_v28 = vld [vmem:[#allocation5 + $0xa8] ss:$16 sps:$4 sm:$0xff]  }
  0x66   :  { %1352 = vmatpush1.bf16.msra.mxu0 %v2941_v13  ;;  %v2965_v29 = vld [vmem:[#allocation5 + $0xc0] ss:$16 sps:$4 sm:$0xff]   ;;  %v2966_v30 = vld [vmem:[#allocation5 + $0xe4] ss:$16 sps:$4 sm:$0xff]   ;;  %v2970_v31 = vld [vmem:[#allocation5 + $0xcc] ss:$16 sps:$4 sm:$0xff]  }
  0x67   :  { %1522 = vmatpush1.bf16.msra.mxu1 %v2938_v11  ;;  %1353 = vmatprep.subr.bf16.mxu0 %v2942_v14  ;;  %v2971_v32 = vld [vmem:[#allocation5 + $0xe0] ss:$16 sps:$4 sm:$0xff]   ;;  %v2968_v33 = vld [vmem:[#allocation5 + $0xc8] ss:$16 sps:$4 sm:$0xff]   ;;  %v2972_v34 = vld [vmem:[#allocation5 + $0x104] ss:$16 sps:$4 sm:$0xff]  }
  0x68   :  { %1523 = vmatprep.subr.bf16.mxu1 %v2946_v15  ;;  %v2976_v35 = vld [vmem:[#allocation5 + $0xec] ss:$16 sps:$4 sm:$0xff]   ;;  %v2974_v36 = vld [vmem:[#allocation5 + $0xe8] ss:$16 sps:$4 sm:$0xff]   ;;  %v2977_v37 = vld [vmem:[#allocation5 + $0x100] ss:$16 sps:$4 sm:$0xff]  }
  0x69   :  { %v2978_v38 = vld [vmem:[#allocation5 + $0x124] ss:$16 sps:$4 sm:$0xff]   ;;  %v2982_v39 = vld [vmem:[#allocation5 + $0x10c] ss:$16 sps:$4 sm:$0xff]   ;;  %v2983_v40 = vld [vmem:[#allocation5 + $0x120] ss:$16 sps:$4 sm:$0xff]  }
  0x6a   :  { %1354 = vmatpush1.bf16.msra.mxu0 %v2947_v16  ;;  %v2980_v41 = vld [vmem:[#allocation5 + $0x108] ss:$16 sps:$4 sm:$0xff]   ;;  %v2984_v42 = vld [vmem:[#allocation5 + $0x144] ss:$16 sps:$4 sm:$0xff]   ;;  %v2988_v43 = vld [vmem:[#allocation5 + $0x12c] ss:$16 sps:$4 sm:$0xff]  }
  0x6b   :  { %1524 = vmatpush1.bf16.msra.mxu1 %v2944_v17  ;;  %1355 = vmatprep.subr.bf16.mxu0 %v2948_v18  ;;  %v2986_v44 = vld [vmem:[#allocation5 + $0x128] ss:$16 sps:$4 sm:$0xff]   ;;  %v2989_v45 = vld [vmem:[#allocation5 + $0x140] ss:$16 sps:$4 sm:$0xff]   ;;  %v2990_v46 = vld [vmem:[#allocation5 + $0x164] ss:$16 sps:$4 sm:$0xff]  }
  0x6c   :  { %1525 = vmatprep.subr.bf16.mxu1 %v2952_v19  ;;  %v2994_v47 = vld [vmem:[#allocation5 + $0x14c] ss:$16 sps:$4 sm:$0xff]   ;;  %v2992_v48 = vld [vmem:[#allocation5 + $0x148] ss:$16 sps:$4 sm:$0xff]   ;;  %v2995_v49 = vld [vmem:[#allocation5 + $0x160] ss:$16 sps:$4 sm:$0xff]  }
  0x6d   :  { %v3022_v50 = vld [vmem:[#allocation2 + $0x4] ss:$28 sps:$4 sm:$0xff]   ;;  %v2996_v51 = vld [vmem:[#allocation5 + $0x184] ss:$16 sps:$4 sm:$0xff]   ;;  %v3001_v54 = vld [vmem:[#allocation5 + $0x180] ss:$16 sps:$4 sm:$0xff]  }
  0x6e   :  { %1356 = vmatpush1.bf16.msra.mxu0 %v2953_v21  ;;  %v3000_v52 = vld [vmem:[#allocation5 + $0x16c] ss:$16 sps:$4 sm:$0xff]   ;;  %1379 = vmatprep.mubr.bf16.mxu0 %v3022_v50  ;;  %v2998_v53 = vld [vmem:[#allocation5 + $0x168] ss:$16 sps:$4 sm:$0xff]   ;;  %v3002_v55 = vld [vmem:[#allocation5 + $0x1a4] ss:$16 sps:$4 sm:$0xff]  }
  0x6f   :  { %1526 = vmatpush1.bf16.msra.mxu1 %v2950_v20  ;;  %1357 = vmatprep.subr.bf16.mxu0 %v2954_v22  ;;  %v3006_v56 = vld [vmem:[#allocation5 + $0x18c] ss:$16 sps:$4 sm:$0xff]   ;;  %v3004_v57 = vld [vmem:[#allocation5 + $0x188] ss:$16 sps:$4 sm:$0xff]   ;;  %v3007_v58 = vld [vmem:[#allocation5 + $0x1a0] ss:$16 sps:$4 sm:$0xff]  }
  0x70   :  { %1527 = vmatprep.subr.bf16.mxu1 %v2958_v23  ;;  %1551 = vmatprep.mubr.bf16.mxu1 %v3022_v50  ;;  %v3008_v59 = vld [vmem:[#allocation5 + $0x1c4] ss:$16 sps:$4 sm:$0xff]   ;;  %v3012_v60 = vld [vmem:[#allocation5 + $0x1ac] ss:$16 sps:$4 sm:$0xff]   ;;  %v3010_v61 = vld [vmem:[#allocation5 + $0x1a8] ss:$16 sps:$4 sm:$0xff]  }
  0x71   :  { %v3013_v62 = vld [vmem:[#allocation5 + $0x1c0] ss:$16 sps:$4 sm:$0xff]   ;;  %v3014_v63 = vld [vmem:[#allocation5 + $0x1e4] ss:$16 sps:$4 sm:$0xff]   ;;  %v3018_v1 = vld [vmem:[#allocation5 + $0x1cc] ss:$16 sps:$4 sm:$0xff]  }
  0x72   :  { %1358 = vmatpush1.bf16.msra.mxu0 %v2959_v24  ;;  %v3016_v2 = vld [vmem:[#allocation5 + $0x1c8] ss:$16 sps:$4 sm:$0xff]   ;;  %v3019_v3 = vld [vmem:[#allocation5 + $0x1e0] ss:$16 sps:$4 sm:$0xff]   ;;  %v3025_v4 = vld [vmem:[#allocation5 + $0x204] ss:$16 sps:$4 sm:$0xff]  }
  0x73   :  { %1528 = vmatpush1.bf16.msra.mxu1 %v2956_v25  ;;  %1359 = vmatprep.subr.bf16.mxu0 %v2960_v26  ;;  %v3028_v5 = vld [vmem:[#allocation5 + $0x1ec] ss:$16 sps:$4 sm:$0xff]   ;;  %v3020_v6 = vld [vmem:[#allocation2] ss:$28 sps:$4 sm:$0xff]   ;;  %v3023_v7 = vld [vmem:[#allocation5 + $0x200] ss:$16 sps:$4 sm:$0xff]  }
  0x74   :  { %1529 = vmatprep.subr.bf16.mxu1 %v2964_v27  ;;  %v3026_v8 = vld [vmem:[#allocation5 + $0x1e8] ss:$16 sps:$4 sm:$0xff]   ;;  %v3031_v9 = vld [vmem:[#allocation5 + $0x224] ss:$16 sps:$4 sm:$0xff]   ;;  %v3034_v10 = vld [vmem:[#allocation5 + $0x20c] ss:$16 sps:$4 sm:$0xff]  }
  0x75   :  { %v3029_v11 = vld [vmem:[#allocation5 + $0x220] ss:$16 sps:$4 sm:$0xff]   ;;  %v3032_v12 = vld [vmem:[#allocation5 + $0x208] ss:$16 sps:$4 sm:$0xff]   ;;  %v3037_v13 = vld [vmem:[#allocation5 + $0x244] ss:$16 sps:$4 sm:$0xff]  }
  0x76   :  { %1360 = vmatpush1.bf16.msra.mxu0 %v2965_v29  ;;  %v3040_v14 = vld [vmem:[#allocation5 + $0x22c] ss:$16 sps:$4 sm:$0xff]   ;;  %v3035_v15 = vld [vmem:[#allocation5 + $0x240] ss:$16 sps:$4 sm:$0xff]   ;;  %v3038_v16 = vld [vmem:[#allocation5 + $0x228] ss:$16 sps:$4 sm:$0xff]  }
  0x77   :  { %1530 = vmatpush1.bf16.msra.mxu1 %v2962_v28  ;;  %1361 = vmatprep.subr.bf16.mxu0 %v2966_v30  ;;  %v3043_v17 = vld [vmem:[#allocation5 + $0x264] ss:$16 sps:$4 sm:$0xff]   ;;  %v3046_v18 = vld [vmem:[#allocation5 + $0x24c] ss:$16 sps:$4 sm:$0xff]   ;;  %v3041_v19 = vld [vmem:[#allocation5 + $0x260] ss:$16 sps:$4 sm:$0xff]  }
  0x78   :  { %1531 = vmatprep.subr.bf16.mxu1 %v2970_v31  ;;  %v3044_v20 = vld [vmem:[#allocation5 + $0x248] ss:$16 sps:$4 sm:$0xff]   ;;  %v3049_v21 = vld [vmem:[#allocation5 + $0x284] ss:$16 sps:$4 sm:$0xff]   ;;  %v3052_v22 = vld [vmem:[#allocation5 + $0x26c] ss:$16 sps:$4 sm:$0xff]  }
  0x79   :  { %v3047_v23 = vld [vmem:[#allocation5 + $0x280] ss:$16 sps:$4 sm:$0xff]   ;;  %v3050_v24 = vld [vmem:[#allocation5 + $0x268] ss:$16 sps:$4 sm:$0xff]   ;;  %v3055_v25 = vld [vmem:[#allocation5 + $0x2a4] ss:$16 sps:$4 sm:$0xff]  }
  0x7a   :  { %1362 = vmatpush1.bf16.msra.mxu0 %v2971_v32  ;;  %v3058_v26 = vld [vmem:[#allocation5 + $0x28c] ss:$16 sps:$4 sm:$0xff]   ;;  %v3053_v27 = vld [vmem:[#allocation5 + $0x2a0] ss:$16 sps:$4 sm:$0xff]   ;;  %v3056_v28 = vld [vmem:[#allocation5 + $0x288] ss:$16 sps:$4 sm:$0xff]  }
  0x7b   :  { %1532 = vmatpush1.bf16.msra.mxu1 %v2968_v33  ;;  %1363 = vmatprep.subr.bf16.mxu0 %v2972_v34  ;;  %v3061_v29 = vld [vmem:[#allocation5 + $0x2c4] ss:$16 sps:$4 sm:$0xff]   ;;  %v3064_v30 = vld [vmem:[#allocation5 + $0x2ac] ss:$16 sps:$4 sm:$0xff]   ;;  %v3059_v31 = vld [vmem:[#allocation5 + $0x2c0] ss:$16 sps:$4 sm:$0xff]  }
  0x7c   :  { %1533 = vmatprep.subr.bf16.mxu1 %v2976_v35  ;;  %v3062_v32 = vld [vmem:[#allocation5 + $0x2a8] ss:$16 sps:$4 sm:$0xff]   ;;  %v3121_v33 = vld [vmem:[#allocation2 + $0xc] ss:$28 sps:$4 sm:$0xff]   ;;  %v3070_v35 = vld [vmem:[#allocation5 + $0x2cc] ss:$16 sps:$4 sm:$0xff]  }
  0x7d   :  { %v3067_v34 = vld [vmem:[#allocation5 + $0x2e4] ss:$16 sps:$4 sm:$0xff]   ;;  %vm3503_vm1 = vmmov 0   ;;  %s3504_s17 = smov [#allocation11]  }
  0x7e   :  { %1364 = vmatpush1.bf16.msra.mxu0 %v2977_v37  ;;  %v3068_v37 = vld [vmem:[#allocation5 + $0x2c8] ss:$16 sps:$4 sm:$0xff]   ;;  %v3091_v50 = vld [vmem:[#allocation5 + $0x364] ss:$16 sps:$4 sm:$0xff]  }
  0x7f   :  { %1534 = vmatpush1.bf16.msra.mxu1 %v2974_v36  ;;  %1365 = vmatprep.subr.bf16.mxu0 %v2978_v38  ;;  %v3065_v36 = vld [vmem:[#allocation5 + $0x2e0] ss:$16 sps:$4 sm:$0xff]   ;;  %v3073_v38 = vld [vmem:[#allocation5 + $0x304] ss:$16 sps:$4 sm:$0xff]  }
  0x80   :  { %1535 = vmatprep.subr.bf16.mxu1 %v2982_v39  ;;  %v3076_v39 = vld [vmem:[#allocation5 + $0x2ec] ss:$16 sps:$4 sm:$0xff]  }
  0x82   :  { %1366 = vmatpush1.bf16.msra.mxu0 %v2983_v40  ;;  %v3071_v40 = vld [vmem:[#allocation5 + $0x300] ss:$16 sps:$4 sm:$0xff]  }
  0x83   :  { %1536 = vmatpush1.bf16.msra.mxu1 %v2980_v41  ;;  %1367 = vmatprep.subr.bf16.mxu0 %v2984_v42  ;;  %v3074_v41 = vld [vmem:[#allocation5 + $0x2e8] ss:$16 sps:$4 sm:$0xff]   ;;  %v3079_v42 = vld [vmem:[#allocation5 + $0x324] ss:$16 sps:$4 sm:$0xff]  }
  0x84   :  { %1537 = vmatprep.subr.bf16.mxu1 %v2988_v43  ;;  %v3082_v43 = vld [vmem:[#allocation5 + $0x30c] ss:$16 sps:$4 sm:$0xff]  }
  0x86   :  { %1368 = vmatpush1.bf16.msra.mxu0 %v2989_v45  ;;  %v3080_v45 = vld [vmem:[#allocation5 + $0x308] ss:$16 sps:$4 sm:$0xff]  }
  0x87   :  { %1538 = vmatpush1.bf16.msra.mxu1 %v2986_v44  ;;  %1369 = vmatprep.subr.bf16.mxu0 %v2990_v46  ;;  %v3077_v44 = vld [vmem:[#allocation5 + $0x320] ss:$16 sps:$4 sm:$0xff]   ;;  %v3085_v46 = vld [vmem:[#allocation5 + $0x344] ss:$16 sps:$4 sm:$0xff]  }
  0x88   :  { %1539 = vmatprep.subr.bf16.mxu1 %v2994_v47  ;;  %v3088_v47 = vld [vmem:[#allocation5 + $0x32c] ss:$16 sps:$4 sm:$0xff]  }
  0x8a   :  { %1370 = vmatpush1.bf16.msra.mxu0 %v2995_v49  ;;  %v3086_v49 = vld [vmem:[#allocation5 + $0x328] ss:$16 sps:$4 sm:$0xff]  }
  0x8b   :  { %1540 = vmatpush1.bf16.msra.mxu1 %v2992_v48  ;;  %1371 = vmatprep.subr.bf16.mxu0 %v2996_v51  ;;  %v3083_v48 = vld [vmem:[#allocation5 + $0x340] ss:$16 sps:$4 sm:$0xff]   ;;  %v3094_v51 = vld [vmem:[#allocation5 + $0x34c] ss:$16 sps:$4 sm:$0xff]  }
  0x8c   :  { %1541 = vmatprep.subr.bf16.mxu1 %v3000_v52  ;;  %v3089_v52 = vld [vmem:[#allocation5 + $0x360] ss:$16 sps:$4 sm:$0xff]  }
  0x8e   :  { %1372 = vmatpush1.bf16.msra.mxu0 %v3001_v54  ;;  %v3097_v54 = vld [vmem:[#allocation5 + $0x384] ss:$16 sps:$4 sm:$0xff]  }
  0x8f   :  { %1542 = vmatpush1.bf16.msra.mxu1 %v2998_v53  ;;  %1373 = vmatprep.subr.bf16.mxu0 %v3002_v55  ;;  %v3092_v53 = vld [vmem:[#allocation5 + $0x348] ss:$16 sps:$4 sm:$0xff]   ;;  %v3100_v55 = vld [vmem:[#allocation5 + $0x36c] ss:$16 sps:$4 sm:$0xff]  }
  0x90   :  { %1543 = vmatprep.subr.bf16.mxu1 %v3006_v56  ;;  %v3095_v56 = vld [vmem:[#allocation5 + $0x380] ss:$16 sps:$4 sm:$0xff]  }
  0x92   :  { %1374 = vmatpush1.bf16.msra.mxu0 %v3007_v58  ;;  %v3103_v58 = vld [vmem:[#allocation5 + $0x3a4] ss:$16 sps:$4 sm:$0xff]  }
  0x93   :  { %1544 = vmatpush1.bf16.msra.mxu1 %v3004_v57  ;;  %1375 = vmatprep.subr.bf16.mxu0 %v3008_v59  ;;  %v3098_v57 = vld [vmem:[#allocation5 + $0x368] ss:$16 sps:$4 sm:$0xff]   ;;  %v3106_v59 = vld [vmem:[#allocation5 + $0x38c] ss:$16 sps:$4 sm:$0xff]  }
  0x94   :  { %1545 = vmatprep.subr.bf16.mxu1 %v3012_v60  ;;  %v3101_v60 = vld [vmem:[#allocation5 + $0x3a0] ss:$16 sps:$4 sm:$0xff]  }
  0x96   :  { %1376 = vmatpush1.bf16.msra.mxu0 %v3013_v62  ;;  %v3109_v62 = vld [vmem:[#allocation5 + $0x3c4] ss:$16 sps:$4 sm:$0xff]  }
  0x97   :  { %1546 = vmatpush1.bf16.msra.mxu1 %v3010_v61  ;;  %1377 = vmatprep.subr.bf16.mxu0 %v3014_v63  ;;  %v3104_v61 = vld [vmem:[#allocation5 + $0x388] ss:$16 sps:$4 sm:$0xff]   ;;  %v3112_v63 = vld [vmem:[#allocation5 + $0x3ac] ss:$16 sps:$4 sm:$0xff]  }
  0x98   :  { %1547 = vmatprep.subr.bf16.mxu1 %v3018_v1  ;;  %v3107_v1 = vld [vmem:[#allocation5 + $0x3c0] ss:$16 sps:$4 sm:$0xff]  }
  0x9a   :  { %1378 = vmatpush1.bf16.msra.mxu0 %v3019_v3  ;;  %v3115_v3 = vld [vmem:[#allocation5 + $0x3e4] ss:$16 sps:$4 sm:$0xff]  }
  0x9b   :  { %1548 = vmatpush1.bf16.msra.mxu1 %v3016_v2  ;;  %1390 = vmatprep.subr.bf16.mxu0 %v3025_v4  ;;  %v3110_v2 = vld [vmem:[#allocation5 + $0x3a8] ss:$16 sps:$4 sm:$0xff]   ;;  %v3118_v4 = vld [vmem:[#allocation5 + $0x3cc] ss:$16 sps:$4 sm:$0xff]  }
  0x9c   :  { %1549 = vmatprep.subr.bf16.mxu1 %v3028_v5  ;;  %v3113_v5 = vld [vmem:[#allocation5 + $0x3e0] ss:$16 sps:$4 sm:$0xff]  }
  0x9d   :  { %1380 = vmatmul.mubr.bf16.vlgmr.msra.gmra.mrb[0].mxu0 %v3020_v6 }
  0x9e   :  { %1391 = vmatpush1.bf16.msra.mxu0 %v3023_v7  ;;  %1422 = vmatprep.mubr.bf16.mxu0 %v3121_v33  ;;  %v3124_v7 = vld [vmem:[#allocation5 + $0x404] ss:$16 sps:$4 sm:$0xff]  }
  0x9f   :  { %1550 = vmatpush1.bf16.msra.mxu1 %v3026_v8  ;;  %1392 = vmatprep.subr.bf16.mxu0 %v3031_v9  ;;  %v3127_v8 = vld [vmem:[#allocation5 + $0x3ec] ss:$16 sps:$4 sm:$0xff]  }
  0xa0   :  { %1562 = vmatprep.subr.bf16.mxu1 %v3034_v10  ;;  %v3119_v9 = vld [vmem:[#allocation2 + $0x8] ss:$28 sps:$4 sm:$0xff]  }
  0xa1   :  { %v3122_v10 = vld [vmem:[#allocation5 + $0x400] ss:$16 sps:$4 sm:$0xff]  }
  0xa2   :  { %1393 = vmatpush1.bf16.msra.mxu0 %v3029_v11  ;;  %1552 = vmatmul.mubr.bf16.vlgmr.msra.gmra.mrb[4].mxu1 %v3020_v6  ;;  %v3116_v6 = vld [vmem:[#allocation5 + $0x3c8] ss:$16 sps:$4 sm:$0xff]  }
  0xa3   :  { %1563 = vmatpush1.bf16.msra.mxu1 %v3032_v12  ;;  %1394 = vmatprep.subr.bf16.mxu0 %v3037_v13  ;;  %v3125_v11 = vld [vmem:[#allocation5 + $0x3e8] ss:$16 sps:$4 sm:$0xff]   ;;  %v3130_v12 = vld [vmem:[#allocation5 + $0x424] ss:$16 sps:$4 sm:$0xff]   ;;  %v3133_v13 = vld [vmem:[#allocation5 + $0x40c] ss:$16 sps:$4 sm:$0xff]  }
  0xa4   :  { %1564 = vmatprep.subr.bf16.mxu1 %v3040_v14  ;;  %1594 = vmatprep.mubr.bf16.mxu1 %v3121_v33  ;;  %v3128_v14 = vld [vmem:[#allocation5 + $0x420] ss:$16 sps:$4 sm:$0xff]   ;;  %v3160_v33 = vld [vmem:[#allocation5 + $0x4c4] ss:$16 sps:$4 sm:$0xff]  }
  0xa6   :  { %1395 = vmatpush1.bf16.msra.mxu0 %v3035_v15  ;;  %v3131_v15 = vld [vmem:[#allocation5 + $0x408] ss:$16 sps:$4 sm:$0xff]  }
  0xa7   :  { %1565 = vmatpush1.bf16.msra.mxu1 %v3038_v16  ;;  %1396 = vmatprep.subr.bf16.mxu0 %v3043_v17  ;;  %v3220_v16 = vld [vmem:[#allocation2 + $0x14] ss:$28 sps:$4 sm:$0xff]   ;;  %v3136_v17 = vld [vmem:[#allocation5 + $0x444] ss:$16 sps:$4 sm:$0xff]  }
  0xa8   :  { %1566 = vmatprep.subr.bf16.mxu1 %v3046_v18  ;;  %v3139_v18 = vld [vmem:[#allocation5 + $0x42c] ss:$16 sps:$4 sm:$0xff]  }
  0xaa   :  { %1397 = vmatpush1.bf16.msra.mxu0 %v3041_v19  ;;  %v3134_v19 = vld [vmem:[#allocation5 + $0x440] ss:$16 sps:$4 sm:$0xff]  }
  0xab   :  { %1567 = vmatpush1.bf16.msra.mxu1 %v3044_v20  ;;  %1398 = vmatprep.subr.bf16.mxu0 %v3049_v21  ;;  %v3137_v20 = vld [vmem:[#allocation5 + $0x428] ss:$16 sps:$4 sm:$0xff]   ;;  %v3142_v21 = vld [vmem:[#allocation5 + $0x464] ss:$16 sps:$4 sm:$0xff]  }
  0xac   :  { %1568 = vmatprep.subr.bf16.mxu1 %v3052_v22  ;;  %v3145_v22 = vld [vmem:[#allocation5 + $0x44c] ss:$16 sps:$4 sm:$0xff]  }
  0xae   :  { %1399 = vmatpush1.bf16.msra.mxu0 %v3047_v23  ;;  %v3140_v23 = vld [vmem:[#allocation5 + $0x460] ss:$16 sps:$4 sm:$0xff]  }
  0xaf   :  { %1569 = vmatpush1.bf16.msra.mxu1 %v3050_v24  ;;  %1400 = vmatprep.subr.bf16.mxu0 %v3055_v25  ;;  %v3143_v24 = vld [vmem:[#allocation5 + $0x448] ss:$16 sps:$4 sm:$0xff]   ;;  %v3148_v25 = vld [vmem:[#allocation5 + $0x484] ss:$16 sps:$4 sm:$0xff]  }
  0xb0   :  { %1570 = vmatprep.subr.bf16.mxu1 %v3058_v26  ;;  %v3151_v26 = vld [vmem:[#allocation5 + $0x46c] ss:$16 sps:$4 sm:$0xff]  }
  0xb2   :  { %1401 = vmatpush1.bf16.msra.mxu0 %v3053_v27  ;;  %v3146_v27 = vld [vmem:[#allocation5 + $0x480] ss:$16 sps:$4 sm:$0xff]  }
  0xb3   :  { %1571 = vmatpush1.bf16.msra.mxu1 %v3056_v28  ;;  %1402 = vmatprep.subr.bf16.mxu0 %v3061_v29  ;;  %v3149_v28 = vld [vmem:[#allocation5 + $0x468] ss:$16 sps:$4 sm:$0xff]   ;;  %v3154_v29 = vld [vmem:[#allocation5 + $0x4a4] ss:$16 sps:$4 sm:$0xff]  }
  0xb4   :  { %1572 = vmatprep.subr.bf16.mxu1 %v3064_v30  ;;  %v3157_v30 = vld [vmem:[#allocation5 + $0x48c] ss:$16 sps:$4 sm:$0xff]  }
  0xb6   :  { %1403 = vmatpush1.bf16.msra.mxu0 %v3059_v31  ;;  %v3152_v31 = vld [vmem:[#allocation5 + $0x4a0] ss:$16 sps:$4 sm:$0xff]  }
  0xb7   :  { %1573 = vmatpush1.bf16.msra.mxu1 %v3062_v32  ;;  %1404 = vmatprep.subr.bf16.mxu0 %v3067_v34  ;;  %v3155_v32 = vld [vmem:[#allocation5 + $0x488] ss:$16 sps:$4 sm:$0xff]   ;;  %v3163_v34 = vld [vmem:[#allocation5 + $0x4ac] ss:$16 sps:$4 sm:$0xff]  }
  0xb8   :  { %1574 = vmatprep.subr.bf16.mxu1 %v3070_v35  ;;  %v3158_v35 = vld [vmem:[#allocation5 + $0x4c0] ss:$16 sps:$4 sm:$0xff]  }
  0xba   :  { %1405 = vmatpush1.bf16.msra.mxu0 %v3065_v36  ;;  %v3161_v36 = vld [vmem:[#allocation5 + $0x4a8] ss:$16 sps:$4 sm:$0xff]  }
  0xbb   :  { %1575 = vmatpush1.bf16.msra.mxu1 %v3068_v37  ;;  %1406 = vmatprep.subr.bf16.mxu0 %v3073_v38  ;;  %v3166_v37 = vld [vmem:[#allocation5 + $0x4e4] ss:$16 sps:$4 sm:$0xff]   ;;  %v3169_v38 = vld [vmem:[#allocation5 + $0x4cc] ss:$16 sps:$4 sm:$0xff]  }
  0xbc   :  { %1576 = vmatprep.subr.bf16.mxu1 %v3076_v39  ;;  %v3164_v39 = vld [vmem:[#allocation5 + $0x4e0] ss:$16 sps:$4 sm:$0xff]  }
  0xbe   :  { %1407 = vmatpush1.bf16.msra.mxu0 %v3071_v40  ;;  %v3167_v40 = vld [vmem:[#allocation5 + $0x4c8] ss:$16 sps:$4 sm:$0xff]  }
  0xbf   :  { %1577 = vmatpush1.bf16.msra.mxu1 %v3074_v41  ;;  %1408 = vmatprep.subr.bf16.mxu0 %v3079_v42  ;;  %v3172_v41 = vld [vmem:[#allocation5 + $0x504] ss:$16 sps:$4 sm:$0xff]   ;;  %v3175_v42 = vld [vmem:[#allocation5 + $0x4ec] ss:$16 sps:$4 sm:$0xff]  }
  0xc0   :  { %1578 = vmatprep.subr.bf16.mxu1 %v3082_v43  ;;  %v3170_v43 = vld [vmem:[#allocation5 + $0x500] ss:$16 sps:$4 sm:$0xff]  }
  0xc2   :  { %1409 = vmatpush1.bf16.msra.mxu0 %v3077_v44  ;;  %v3173_v44 = vld [vmem:[#allocation5 + $0x4e8] ss:$16 sps:$4 sm:$0xff]  }
  0xc3   :  { %1579 = vmatpush1.bf16.msra.mxu1 %v3080_v45  ;;  %1410 = vmatprep.subr.bf16.mxu0 %v3085_v46  ;;  %v3178_v45 = vld [vmem:[#allocation5 + $0x524] ss:$16 sps:$4 sm:$0xff]   ;;  %v3181_v46 = vld [vmem:[#allocation5 + $0x50c] ss:$16 sps:$4 sm:$0xff]  }
  0xc4   :  { %1580 = vmatprep.subr.bf16.mxu1 %v3088_v47  ;;  %v3176_v47 = vld [vmem:[#allocation5 + $0x520] ss:$16 sps:$4 sm:$0xff]  }
  0xc6   :  { %1411 = vmatpush1.bf16.msra.mxu0 %v3083_v48  ;;  %v3179_v48 = vld [vmem:[#allocation5 + $0x508] ss:$16 sps:$4 sm:$0xff]  }
  0xc7   :  { %1581 = vmatpush1.bf16.msra.mxu1 %v3086_v49  ;;  %1412 = vmatprep.subr.bf16.mxu0 %v3091_v50  ;;  %v3184_v49 = vld [vmem:[#allocation5 + $0x544] ss:$16 sps:$4 sm:$0xff]   ;;  %v3187_v50 = vld [vmem:[#allocation5 + $0x52c] ss:$16 sps:$4 sm:$0xff]  }
  0xc8   :  { %1582 = vmatprep.subr.bf16.mxu1 %v3094_v51  ;;  %v3182_v51 = vld [vmem:[#allocation5 + $0x540] ss:$16 sps:$4 sm:$0xff]  }
  0xca   :  { %1413 = vmatpush1.bf16.msra.mxu0 %v3089_v52  ;;  %v3185_v52 = vld [vmem:[#allocation5 + $0x528] ss:$16 sps:$4 sm:$0xff]  }
  0xcb   :  { %1583 = vmatpush1.bf16.msra.mxu1 %v3092_v53  ;;  %1414 = vmatprep.subr.bf16.mxu0 %v3097_v54  ;;  %v3190_v53 = vld [vmem:[#allocation5 + $0x564] ss:$16 sps:$4 sm:$0xff]   ;;  %v3193_v54 = vld [vmem:[#allocation5 + $0x54c] ss:$16 sps:$4 sm:$0xff]  }
  0xcc   :  { %1584 = vmatprep.subr.bf16.mxu1 %v3100_v55  ;;  %v3188_v55 = vld [vmem:[#allocation5 + $0x560] ss:$16 sps:$4 sm:$0xff]  }
  0xce   :  { %1415 = vmatpush1.bf16.msra.mxu0 %v3095_v56  ;;  %v3191_v56 = vld [vmem:[#allocation5 + $0x548] ss:$16 sps:$4 sm:$0xff]  }
  0xcf   :  { %1585 = vmatpush1.bf16.msra.mxu1 %v3098_v57  ;;  %1416 = vmatprep.subr.bf16.mxu0 %v3103_v58  ;;  %v3196_v57 = vld [vmem:[#allocation5 + $0x584] ss:$16 sps:$4 sm:$0xff]   ;;  %v3199_v58 = vld [vmem:[#allocation5 + $0x56c] ss:$16 sps:$4 sm:$0xff]  }
  0xd0   :  { %1586 = vmatprep.subr.bf16.mxu1 %v3106_v59  ;;  %v3194_v59 = vld [vmem:[#allocation5 + $0x580] ss:$16 sps:$4 sm:$0xff]  }
  0xd2   :  { %1417 = vmatpush1.bf16.msra.mxu0 %v3101_v60  ;;  %v3197_v60 = vld [vmem:[#allocation5 + $0x568] ss:$16 sps:$4 sm:$0xff]  }
  0xd3   :  { %1587 = vmatpush1.bf16.msra.mxu1 %v3104_v61  ;;  %1418 = vmatprep.subr.bf16.mxu0 %v3109_v62  ;;  %v3202_v61 = vld [vmem:[#allocation5 + $0x5a4] ss:$16 sps:$4 sm:$0xff]   ;;  %v3205_v62 = vld [vmem:[#allocation5 + $0x58c] ss:$16 sps:$4 sm:$0xff]  }
  0xd4   :  { %1588 = vmatprep.subr.bf16.mxu1 %v3112_v63  ;;  %v3200_v63 = vld [vmem:[#allocation5 + $0x5a0] ss:$16 sps:$4 sm:$0xff]  }
  0xd6   :  { %1419 = vmatpush1.bf16.msra.mxu0 %v3107_v1  ;;  %v3203_v1 = vld [vmem:[#allocation5 + $0x588] ss:$16 sps:$4 sm:$0xff]  }
  0xd7   :  { %1589 = vmatpush1.bf16.msra.mxu1 %v3110_v2  ;;  %1420 = vmatprep.subr.bf16.mxu0 %v3115_v3  ;;  %v3208_v2 = vld [vmem:[#allocation5 + $0x5c4] ss:$16 sps:$4 sm:$0xff]   ;;  %v3211_v3 = vld [vmem:[#allocation5 + $0x5ac] ss:$16 sps:$4 sm:$0xff]  }
  0xd8   :  { %1590 = vmatprep.subr.bf16.mxu1 %v3118_v4  ;;  %v3206_v4 = vld [vmem:[#allocation5 + $0x5c0] ss:$16 sps:$4 sm:$0xff]  }
  0xda   :  { %1421 = vmatpush1.bf16.msra.mxu0 %v3113_v5  ;;  %v3209_v5 = vld [vmem:[#allocation5 + $0x5a8] ss:$16 sps:$4 sm:$0xff]  }
  0xdb   :  { %1591 = vmatpush1.bf16.msra.mxu1 %v3116_v6  ;;  %1433 = vmatprep.subr.bf16.mxu0 %v3124_v7  ;;  %v3214_v6 = vld [vmem:[#allocation5 + $0x5e4] ss:$16 sps:$4 sm:$0xff]   ;;  %v3217_v7 = vld [vmem:[#allocation5 + $0x5cc] ss:$16 sps:$4 sm:$0xff]  }
  0xdc   :  { %1592 = vmatprep.subr.bf16.mxu1 %v3127_v8  ;;  %v3212_v8 = vld [vmem:[#allocation5 + $0x5e0] ss:$16 sps:$4 sm:$0xff]  }
  0xdd   :  { %1423 = vmatmul.mubr.bf16.vlgmr.msra.gmra.mrb[0].mxu0 %v3119_v9 }
  0xde   :  { %1434 = vmatpush1.bf16.msra.mxu0 %v3122_v10  ;;  %1465 = vmatprep.mubr.bf16.mxu0 %v3220_v16  ;;  %v3229_v10 = vld [vmem:[#allocation7 + $0x4] ss:$8 sps:$4 sm:$0xff]  }
  0xdf   :  { %1593 = vmatpush1.bf16.msra.mxu1 %v3125_v11  ;;  %1435 = vmatprep.subr.bf16.mxu0 %v3130_v12  ;;  %v3223_v11 = vld [vmem:[#allocation5 + $0x5ec] ss:$16 sps:$4 sm:$0xff]   ;;  %v3218_v12 = vld [vmem:[#allocation2 + $0x10] ss:$28 sps:$4 sm:$0xff]  }
  0xe0   :  { %1605 = vmatprep.subr.bf16.mxu1 %v3133_v13  ;;  %v3227_v13 = vld [vmem:[#allocation7] ss:$8 sps:$4 sm:$0xff]  }
  0xe2   :  { %1436 = vmatpush1.bf16.msra.mxu0 %v3128_v14  ;;  %1595 = vmatmul.mubr.bf16.vlgmr.msra.gmra.mrb[4].mxu1 %v3119_v9  ;;  %v3215_v9 = vld [vmem:[#allocation5 + $0x5c8] ss:$16 sps:$4 sm:$0xff]  }
  0xe3   :  { %1606 = vmatpush1.bf16.msra.mxu1 %v3131_v15  ;;  %1437 = vmatprep.subr.bf16.mxu0 %v3136_v17  ;;  %v3221_v14 = vld [vmem:[#allocation5 + $0x5e8] ss:$16 sps:$4 sm:$0xff]   ;;  %v3232_v15 = vld [vmem:[#allocation7 + $0x14] ss:$8 sps:$4 sm:$0xff]  }
  0xe4   :  { %1607 = vmatprep.subr.bf16.mxu1 %v3139_v18  ;;  %1637 = vmatprep.mubr.bf16.mxu1 %v3220_v16  ;;  %v3226_v16 = vld [vmem:[#allocation5 + $0x60c] ss:$16 sps:$4 sm:$0xff]   ;;  %v3230_v17 = vld [vmem:[#allocation7 + $0x10] ss:$8 sps:$4 sm:$0xff]  }
  0xe5   :  { %v3224_v18 = vld [vmem:[#allocation5 + $0x608] ss:$16 sps:$4 sm:$0xff]  }
  0xe6   :  { %1438 = vmatpush1.bf16.msra.mxu0 %v3134_v19  ;;  %v3235_v19 = vld [vmem:[#allocation7 + $0x24] ss:$8 sps:$4 sm:$0xff]  }
  0xe7   :  { %1608 = vmatpush1.bf16.msra.mxu1 %v3137_v20  ;;  %1439 = vmatprep.subr.bf16.mxu0 %v3142_v21  ;;  %v3233_v20 = vld [vmem:[#allocation7 + $0x20] ss:$8 sps:$4 sm:$0xff]   ;;  %v3238_v21 = vld [vmem:[#allocation7 + $0x34] ss:$8 sps:$4 sm:$0xff]  }
  0xe8   :  { %1609 = vmatprep.subr.bf16.mxu1 %v3145_v22  ;;  %v3236_v22 = vld [vmem:[#allocation7 + $0x30] ss:$8 sps:$4 sm:$0xff]  }
  0xea   :  { %1440 = vmatpush1.bf16.msra.mxu0 %v3140_v23  ;;  %v3241_v23 = vld [vmem:[#allocation7 + $0x44] ss:$8 sps:$4 sm:$0xff]  }
  0xeb   :  { %1610 = vmatpush1.bf16.msra.mxu1 %v3143_v24  ;;  %1441 = vmatprep.subr.bf16.mxu0 %v3148_v25  ;;  %v3239_v24 = vld [vmem:[#allocation7 + $0x40] ss:$8 sps:$4 sm:$0xff]   ;;  %v3244_v25 = vld [vmem:[#allocation7 + $0x54] ss:$8 sps:$4 sm:$0xff]  }
  0xec   :  { %1611 = vmatprep.subr.bf16.mxu1 %v3151_v26  ;;  %v3347_v26 = vld [vmem:[#allocation2 + $0x18] ss:$28 sps:$4 sm:$0xff]  }
  0xee   :  { %1442 = vmatpush1.bf16.msra.mxu0 %v3146_v27  ;;  %v3242_v27 = vld [vmem:[#allocation7 + $0x50] ss:$8 sps:$4 sm:$0xff]  }
  0xef   :  { %1612 = vmatpush1.bf16.msra.mxu1 %v3149_v28  ;;  %1443 = vmatprep.subr.bf16.mxu0 %v3154_v29  ;;  %v3247_v28 = vld [vmem:[#allocation7 + $0x64] ss:$8 sps:$4 sm:$0xff]   ;;  %v3245_v29 = vld [vmem:[#allocation7 + $0x60] ss:$8 sps:$4 sm:$0xff]  }
  0xf0   :  { %1613 = vmatprep.subr.bf16.mxu1 %v3157_v30 }
  0xf2   :  { %1444 = vmatpush1.bf16.msra.mxu0 %v3152_v31 }
  0xf3   :  { %1614 = vmatpush1.bf16.msra.mxu1 %v3155_v32  ;;  %1445 = vmatprep.subr.bf16.mxu0 %v3160_v33  ;;  %v3248_v32 = vld [vmem:[#allocation7 + $0x70] ss:$8 sps:$4 sm:$0xff]  }
  0xf4   :  { %1615 = vmatprep.subr.bf16.mxu1 %v3163_v34  ;;  %v3253_v34 = vld [vmem:[#allocation7 + $0x84] ss:$8 sps:$4 sm:$0xff]  }
  0xf6   :  { %1446 = vmatpush1.bf16.msra.mxu0 %v3158_v35 }
  0xf7   :  { %1616 = vmatpush1.bf16.msra.mxu1 %v3161_v36  ;;  %1447 = vmatprep.subr.bf16.mxu0 %v3166_v37  ;;  %v3251_v36 = vld [vmem:[#allocation7 + $0x80] ss:$8 sps:$4 sm:$0xff]   ;;  %v3256_v37 = vld [vmem:[#allocation7 + $0x94] ss:$8 sps:$4 sm:$0xff]  }
  0xf8   :  { %1617 = vmatprep.subr.bf16.mxu1 %v3169_v38  ;;  %v3254_v38 = vld [vmem:[#allocation7 + $0x90] ss:$8 sps:$4 sm:$0xff]  }
  0xfa   :  { %1448 = vmatpush1.bf16.msra.mxu0 %v3164_v39  ;;  %v3259_v39 = vld [vmem:[#allocation7 + $0xa4] ss:$8 sps:$4 sm:$0xff]  }
  0xfb   :  { %1618 = vmatpush1.bf16.msra.mxu1 %v3167_v40  ;;  %1449 = vmatprep.subr.bf16.mxu0 %v3172_v41  ;;  %v3257_v40 = vld [vmem:[#allocation7 + $0xa0] ss:$8 sps:$4 sm:$0xff]   ;;  %v3262_v41 = vld [vmem:[#allocation7 + $0xb4] ss:$8 sps:$4 sm:$0xff]  }
  0xfc   :  { %1619 = vmatprep.subr.bf16.mxu1 %v3175_v42  ;;  %v3260_v42 = vld [vmem:[#allocation7 + $0xb0] ss:$8 sps:$4 sm:$0xff]  }
  0xfe   :  { %1450 = vmatpush1.bf16.msra.mxu0 %v3170_v43  ;;  %v3265_v43 = vld [vmem:[#allocation7 + $0xc4] ss:$8 sps:$4 sm:$0xff]  }
  0xff   :  { %1620 = vmatpush1.bf16.msra.mxu1 %v3173_v44  ;;  %1451 = vmatprep.subr.bf16.mxu0 %v3178_v45  ;;  %v3263_v44 = vld [vmem:[#allocation7 + $0xc0] ss:$8 sps:$4 sm:$0xff]   ;;  %v3268_v45 = vld [vmem:[#allocation7 + $0xd4] ss:$8 sps:$4 sm:$0xff]  }
 0x100   :  { %1621 = vmatprep.subr.bf16.mxu1 %v3181_v46  ;;  %v3266_v46 = vld [vmem:[#allocation7 + $0xd0] ss:$8 sps:$4 sm:$0xff]  }
 0x102   :  { %1452 = vmatpush1.bf16.msra.mxu0 %v3176_v47  ;;  %v3271_v47 = vld [vmem:[#allocation7 + $0xe4] ss:$8 sps:$4 sm:$0xff]  }
 0x103   :  { %1622 = vmatpush1.bf16.msra.mxu1 %v3179_v48  ;;  %1453 = vmatprep.subr.bf16.mxu0 %v3184_v49  ;;  %v3269_v48 = vld [vmem:[#allocation7 + $0xe0] ss:$8 sps:$4 sm:$0xff]   ;;  %v3274_v49 = vld [vmem:[#allocation7 + $0xf4] ss:$8 sps:$4 sm:$0xff]  }
 0x104   :  { %1623 = vmatprep.subr.bf16.mxu1 %v3187_v50  ;;  %v3272_v50 = vld [vmem:[#allocation7 + $0xf0] ss:$8 sps:$4 sm:$0xff]  }
 0x106   :  { %1454 = vmatpush1.bf16.msra.mxu0 %v3182_v51  ;;  %v3277_v51 = vld [vmem:[#allocation7 + $0x104] ss:$8 sps:$4 sm:$0xff]  }
 0x107   :  { %1624 = vmatpush1.bf16.msra.mxu1 %v3185_v52  ;;  %1455 = vmatprep.subr.bf16.mxu0 %v3190_v53  ;;  %v3323_v52 = vld [vmem:[#allocation8 + $0x40] sm:$0xff]  }
 0x108   :  { %1625 = vmatprep.subr.bf16.mxu1 %v3193_v54  ;;  %v3324_v53 = vld [vmem:[#allocation8] sm:$0xff]   ;;  %v3325_v54 = vld [vmem:[#allocation8 + $0x48] sm:$0xff]  }
 0x10a   :  { %1456 = vmatpush1.bf16.msra.mxu0 %v3188_v55  ;;  %v3326_v55 = vld [vmem:[#allocation8 + $0x8] sm:$0xff]  }
 0x10b   :  { %1626 = vmatpush1.bf16.msra.mxu1 %v3191_v56  ;;  %1457 = vmatprep.subr.bf16.mxu0 %v3196_v57  ;;  %v3327_v56 = vld [vmem:[#allocation8 + $0x50] sm:$0xff]  }
 0x10c   :  { %1627 = vmatprep.subr.bf16.mxu1 %v3199_v58  ;;  %v3328_v57 = vld [vmem:[#allocation8 + $0x10] sm:$0xff]   ;;  %v3329_v58 = vld [vmem:[#allocation8 + $0x58] sm:$0xff]  }
 0x10e   :  { %1458 = vmatpush1.bf16.msra.mxu0 %v3194_v59  ;;  %v3330_v59 = vld [vmem:[#allocation8 + $0x18] sm:$0xff]  }
 0x10f   :  { %1628 = vmatpush1.bf16.msra.mxu1 %v3197_v60  ;;  %1459 = vmatprep.subr.bf16.mxu0 %v3202_v61  ;;  %v3331_v60 = vld [vmem:[#allocation8 + $0x60] sm:$0xff]  }
 0x110   :  { %1629 = vmatprep.subr.bf16.mxu1 %v3205_v62  ;;  %v3332_v61 = vld [vmem:[#allocation8 + $0x20] sm:$0xff]   ;;  %v3333_v62 = vld [vmem:[#allocation8 + $0x68] sm:$0xff]  }
 0x112   :  { %1460 = vmatpush1.bf16.msra.mxu0 %v3200_v63  ;;  %v308_v63 = vlaneseq }
 0x113   :  { %1630 = vmatpush1.bf16.msra.mxu1 %v3203_v1  ;;  %1461 = vmatprep.subr.bf16.mxu0 %v3208_v2 }
 0x114   :  { %1631 = vmatprep.subr.bf16.mxu1 %v3211_v3  ;;  %v3633_v1 = vshrl.u32 %v308_v63, 7  ;;  %v306_v3 = vld [vmem:[%s3680_s2] sm:$0xf]  ;;  %v3310_v63 = vld [vmem:[#allocation7 + $0x1b4] ss:$8 sps:$4 sm:$0xff]  }
 0x116   :  { %1462 = vmatpush1.bf16.msra.mxu0 %v3206_v4  ;;  %v310_v2 = vsub.s32 0, %v3633_v1  ;;  %v314_v4 = vsub.s32 1, %v3633_v1 }
 0x117   :  { %1632 = vmatpush1.bf16.msra.mxu1 %v3209_v5  ;;  %1463 = vmatprep.subr.bf16.mxu0 %v3214_v6 }
 0x118   :  { %1633 = vmatprep.subr.bf16.mxu1 %v3217_v7  ;;  %v311_v5 = vrot.slane %v306_v3, %v310_v2  ;;  %v315_v6 = vrot.slane %v306_v3, %v314_v4 }
 0x11a   :  { %1464 = vmatpush1.bf16.msra.mxu0 %v3212_v8 }
 0x11b   :  { %1634 = vmatpush1.bf16.msra.mxu1 %v3215_v9  ;;  %2099 = vmatprep.subr.bf16.mxu0 %v3229_v10 }
 0x11c   :  { %1635 = vmatprep.subr.bf16.mxu1 %v3223_v11 }
 0x11d   :  { %1466 = vmatmul.mubr.bf16.vlgmr.msra.gmra.mrb[0].mxu0 %v3218_v12 }
 0x11e   :  { %2100 = vmatpush1.bf16.msra.mxu0 %v3227_v13 }
 0x11f   :  { %1636 = vmatpush1.bf16.msra.mxu1 %v3221_v14  ;;  %2101 = vmatprep.subr.bf16.mxu0 %v3232_v15 }
 0x120   :  { %1648 = vmatprep.subr.bf16.mxu1 %v3226_v16 }
 0x122   :  { %1638 = vmatmul.mubr.bf16.vlgmr.msra.gmra.mrb[4].mxu1 %v3218_v12  ;;  %2102 = vmatpush1.bf16.msra.mxu0 %v3230_v17 }
 0x123   :  { %1649 = vmatpush1.bf16.msra.mxu1 %v3224_v18  ;;  %1680 = vmatprep.mubr.bf16.mxu1 %v3501_v0  ;;  %v3250_v0 = vld [vmem:[#allocation7 + $0x74] ss:$8 sps:$4 sm:$0xff]  }
 0x124   :  { %2103 = vmatprep.subr.bf16.mxu0 %v3235_v19  ;;  %2815 = vmatprep.subr.bf16.mxu1 %v3323_v52  ;;  %v3290_v52 = vld [vmem:[#allocation7 + $0x150] ss:$8 sps:$4 sm:$0xff]  }
 0x126   :  { %2104 = vmatpush1.bf16.msra.mxu0 %v3233_v20 }
 0x127   :  { %2105 = vmatprep.subr.bf16.mxu0 %v3238_v21 }
 0x12a   :  { %2106 = vmatpush1.bf16.msra.mxu0 %v3236_v22 }
 0x12b   :  { %2107 = vmatprep.subr.bf16.mxu0 %v3241_v23 }
 0x12e   :  { %2715 = vmatmul.mubr.msk.bf16.vlgmr.msra.gmra.mrb[4].mxu1 %vm1343_vm0, %v3347_v26  ;;  %2108 = vmatpush1.bf16.msra.mxu0 %v3239_v24  ;;  %v318_v26 = vsub.s32 2, %v3633_v1 }
 0x12f   :  { %2109 = vmatprep.subr.bf16.mxu0 %v3244_v25  ;;  %2816 = vmatpush3.bf16.msra.mxu1 %v3324_v53  ;;  %v3275_v25 = vld [vmem:[#allocation7 + $0x100] ss:$8 sps:$4 sm:$0xff]   ;;  %v3295_v53 = vld [vmem:[#allocation7 + $0x164] ss:$8 sps:$4 sm:$0xff]  }
 0x130   :  { %2817 = vmatprep.subr.bf16.mxu1 %v3325_v54  ;;  %v3293_v54 = vld [vmem:[#allocation7 + $0x160] ss:$8 sps:$4 sm:$0xff]  }
 0x132   :  { %2110 = vmatpush1.bf16.msra.mxu0 %v3242_v27  ;;  %v3280_v27 = vld [vmem:[#allocation7 + $0x114] ss:$8 sps:$4 sm:$0xff]  }
 0x133   :  { %2111 = vmatprep.subr.bf16.mxu0 %v3247_v28  ;;  %2818 = vmatpush3.bf16.msra.mxu1 %v3326_v55  ;;  %v322_v28 = vsub.s32 3, %v3633_v1  ;;  %v3298_v55 = vld [vmem:[#allocation7 + $0x174] ss:$8 sps:$4 sm:$0xff]   ;;  %v3340_v1 = vld [vmem:[#allocation10 + $0x8] sm:$0xff]  }
 0x134   :  { %2819 = vmatprep.subr.bf16.mxu1 %v3327_v56  ;;  %v3296_v56 = vld [vmem:[#allocation7 + $0x170] ss:$8 sps:$4 sm:$0xff]  }
 0x135   :  { %v3625_v30 = vpop.f32.mrb[0].mxu1 }
 0x136   :  { %v3627_v31 = vpop.f32.mrb[1].mxu1  ;;  %2112 = vmatpush1.bf16.msra.mxu0 %v3245_v29  ;;  %v319_v29 = vrot.slane %v306_v3, %v318_v26 }
 0x137   :  { %v3629_v33 = vpop.f32.mrb[2].mxu1  ;;  %2113 = vmatprep.subr.bf16.mxu0 %v3250_v0  ;;  %2820 = vmatpush3.bf16.msra.mxu1 %v3328_v57  ;;  %v3278_v0 = vld [vmem:[#allocation7 + $0x110] ss:$8 sps:$4 sm:$0xff]   ;;  %v3301_v57 = vld [vmem:[#allocation7 + $0x184] ss:$8 sps:$4 sm:$0xff]  }
 0x138   :  { %v3631_v35 = vpop.f32.mrb[3].mxu1  ;;  %2821 = vmatprep.subr.bf16.mxu1 %v3329_v58  ;;  %v3299_v58 = vld [vmem:[#allocation7 + $0x180] ss:$8 sps:$4 sm:$0xff]  }
 0x13a   :  { %2114 = vmatpush1.bf16.msra.mxu0 %v3248_v32 }
 0x13b   :  { %2115 = vmatprep.subr.bf16.mxu0 %v3253_v34  ;;  %2822 = vmatpush3.bf16.msra.mxu1 %v3330_v59  ;;  %v3304_v59 = vld [vmem:[#allocation7 + $0x194] ss:$8 sps:$4 sm:$0xff]  }
 0x13c   :  { %2823 = vmatprep.subr.bf16.mxu1 %v3331_v60  ;;  %v3302_v60 = vld [vmem:[#allocation7 + $0x190] ss:$8 sps:$4 sm:$0xff]  }
 0x13e   :  { %2116 = vmatpush1.bf16.msra.mxu0 %v3251_v36 }
 0x13f   :  { %2117 = vmatprep.subr.bf16.mxu0 %v3256_v37  ;;  %2824 = vmatpush3.bf16.msra.mxu1 %v3332_v61  ;;  %v3307_v61 = vld [vmem:[#allocation7 + $0x1a4] ss:$8 sps:$4 sm:$0xff]  }
 0x140   :  { %2825 = vmatprep.subr.bf16.mxu1 %v3333_v62  ;;  %v3305_v62 = vld [vmem:[#allocation7 + $0x1a0] ss:$8 sps:$4 sm:$0xff]  }
 0x142   :  { %2118 = vmatpush1.bf16.msra.mxu0 %v3254_v38  ;;  %v3286_v38 = vld [vmem:[#allocation7 + $0x134] ss:$8 sps:$4 sm:$0xff]  }
 0x143   :  { %2119 = vmatprep.subr.bf16.mxu0 %v3259_v39 }
 0x146   :  { %2120 = vmatpush1.bf16.msra.mxu0 %v3257_v40 }
 0x147   :  { %2121 = vmatprep.subr.bf16.mxu0 %v3262_v41 }
 0x14a   :  { %2122 = vmatpush1.bf16.msra.mxu0 %v3260_v42 }
 0x14b   :  { %2123 = vmatprep.subr.bf16.mxu0 %v3265_v43 }
 0x14e   :  { %2124 = vmatpush1.bf16.msra.mxu0 %v3263_v44  ;;  %v3284_v44 = vld [vmem:[#allocation7 + $0x130] ss:$8 sps:$4 sm:$0xff]  }
 0x14f   :  { %2125 = vmatprep.subr.bf16.mxu0 %v3268_v45 }
 0x152   :  { %2126 = vmatpush1.bf16.msra.mxu0 %v3266_v46 }
 0x153   :  { %2127 = vmatprep.subr.bf16.mxu0 %v3271_v47  ;;  %v3289_v47 = vld [vmem:[#allocation7 + $0x144] ss:$8 sps:$4 sm:$0xff]  }
 0x156   :  { %2128 = vmatpush1.bf16.msra.mxu0 %v3269_v48 }
 0x157   :  { %2129 = vmatprep.subr.bf16.mxu0 %v3274_v49 }
 0x15a   :  { %2130 = vmatpush1.bf16.msra.mxu0 %v3272_v50  ;;  %v3287_v50 = vld [vmem:[#allocation7 + $0x140] ss:$8 sps:$4 sm:$0xff]  }
 0x15b   :  { %2142 = vmatprep.subr.bf16.mxu0 %v3277_v51  ;;  %v3292_v51 = vld [vmem:[#allocation7 + $0x154] ss:$8 sps:$4 sm:$0xff]  }
 0x1f0   :  { %v1467_v7 = vpop.f32.mrb[0].mxu0 }
 0x1f1   :  { %v2866_v8 = vadd.f32 %v1467_v7, %v311_v5  ;;  %v1469_v9 = vpop.f32.mrb[1].mxu0  ;;  %v3316_v7 = vld [vmem:[#allocation7 + $0x1d4] ss:$8 sps:$4 sm:$0xff]  }
 0x1f2   :  { %v2868_v10 = vadd.f32 %v1469_v9, %v315_v6  ;;  %v1471_v11 = vpop.f32.mrb[2].mxu0  ;;  %v3319_v9 = vld [vmem:[#allocation7 + $0x1e4] ss:$8 sps:$4 sm:$0xff]  }
 0x1f3   :  { %v2867_v12 = vadd.f32 %v2866_v8, %v3625_v30  ;;  %v2870_v13 = vadd.f32 %v1471_v11, %v311_v5  ;;  %v1473_v14 = vpop.f32.mrb[3].mxu0  ;;  %v323_v30 = vrot.slane %v306_v3, %v322_v28  ;;  %v3308_v3 = vld [vmem:[#allocation7 + $0x1b0] ss:$8 sps:$4 sm:$0xff]   ;;  %v3313_v5 = vld [vmem:[#allocation7 + $0x1c4] ss:$8 sps:$4 sm:$0xff]  }
 0x1f4   :  { %v2869_v15 = vadd.f32 %v2868_v10, %v3627_v31  ;;  %v2872_v16 = vadd.f32 %v1473_v14, %v315_v6  ;;  %v3283_v31 = vld [vmem:[#allocation7 + $0x124] ss:$8 sps:$4 sm:$0xff]   ;;  %v3311_v6 = vld [vmem:[#allocation7 + $0x1c0] ss:$8 sps:$4 sm:$0xff]   ;;  %v3314_v8 = vld [vmem:[#allocation7 + $0x1d0] ss:$8 sps:$4 sm:$0xff]  }
 0x1f5   :  { %v2871_v17 = vadd.f32 %v2870_v13, %v3629_v33  ;;  %v1691_v19 = vmax.f32 %v2867_v12, 0.0  ;;  %v3317_v10 = vld [vmem:[#allocation7 + $0x1e0] ss:$8 sps:$4 sm:$0xff]   ;;  %v3322_v11 = vld [vmem:[#allocation7 + $0x1f4] ss:$8 sps:$4 sm:$0xff]  }
 0x1f6   :  { %v2873_v18 = vadd.f32 %v2872_v16, %v3631_v35  ;;  %v1692_v21 = vmax.f32 %v2869_v15, 0.0  ;;  %v3281_v35 = vld [vmem:[#allocation7 + $0x120] ss:$8 sps:$4 sm:$0xff]   ;;  %v3320_v12 = vld [vmem:[#allocation7 + $0x1f0] ss:$8 sps:$4 sm:$0xff]  }
 0x1f7   :  { %v1695_v20 = vmax.f32 %v2871_v17, 0.0  ;;  %v3334_v13 = vld [vmem:[#allocation8 + $0x28] sm:$0xff]   ;;  %v3335_v14 = vld [vmem:[#allocation8 + $0x70] sm:$0xff]   ;;  %v3337_v16 = vld [vmem:[#allocation8 + $0x78] sm:$0xff]  }
 0x1f8   :  { %v1696_v22 = vmax.f32 %v2873_v18, 0.0  ;;  %2826 = vmatpush3.bf16.msra.mxu1 %v3334_v13  ;;  %v3336_v15 = vld [vmem:[#allocation8 + $0x30] sm:$0xff]   ;;  %v3338_v17 = vld [vmem:[#allocation8 + $0x38] sm:$0xff]   ;;  %v3502_v18 = vmov 0.0  }
 0x1f9   :  { %v1699_v23 = vpack.c.bf16 %v1695_v20, %v1691_v19  ;;  %2827 = vmatprep.subr.bf16.mxu1 %v3335_v14  ;;  %v1767_v19 = vld [vmem:[%s3682_s4] sm:$0x3] }
 0x1fa   :  { %v1700_v24 = vpack.c.bf16 %v1696_v22, %v1692_v21  ;;  %v1772_v20 = vrot.slane %v1767_v19, %v310_v2  ;;  %v1776_v21 = vrot.slane %v1767_v19, %v314_v4  ;;  %v3341_v2 = vld [vmem:[#allocation10 + $0x10] sm:$0xff]   ;;  %v3342_v4 = vld [vmem:[#allocation10 + $0x18] sm:$0xff]  }
 0x1fc   :  { %2131 = vmatprep.mubr.bf16.mxu0 %v1700_v24  ;;  %2828 = vmatpush3.bf16.msra.mxu1 %v3336_v15 }
 0x1fd   :  { %2132 = vmatmul.mubr.bf16.vlgmr.msra.gmra.mrb[4].mxu0 %v1699_v23  ;;  %2829 = vmatprep.subr.bf16.mxu1 %v3337_v16 }
 0x1fe   :  { %2143 = vmatpush1.bf16.msra.mxu0 %v3275_v25 }
 0x1ff   :  { %2144 = vmatprep.subr.bf16.mxu0 %v3280_v27 }
 0x200   :  { %2830 = vmatpush3.bf16.msra.mxu1 %v3338_v17 }
 0x201   :  { %v1682_v32 = vpop.f32.mrb[4].mxu1  ;;  %2846 = vmatprep.subr.bf16.mxu1 %v3502_v18 }
 0x202   :  { %v2874_v33 = vadd.f32 %v1682_v32, %v319_v29  ;;  %v1684_v34 = vpop.f32.mrb[5].mxu1  ;;  %2145 = vmatpush1.bf16.msra.mxu0 %v3278_v0 }
 0x203   :  { %v2875_v36 = vadd.f32 %v1684_v34, %v323_v30  ;;  %v1686_v37 = vpop.f32.mrb[6].mxu1  ;;  %2146 = vmatprep.subr.bf16.mxu0 %v3283_v31 }
 0x204   :  { %v2876_v39 = vadd.f32 %v1686_v37, %v319_v29  ;;  %v1688_v40 = vpop.f32.mrb[7].mxu1  ;;  %v1693_v42 = vmax.f32 %v2874_v33, 0.0  ;;  %v3344_v37 = vld [vmem:[#allocation10 + $0x28] sm:$0xff]  }
 0x205   :  { %v2877_v41 = vadd.f32 %v1688_v40, %v323_v30  ;;  %v1694_v45 = vmax.f32 %v2875_v36, 0.0  ;;  %v3343_v36 = vld [vmem:[#allocation10 + $0x20] sm:$0xff]  }
 0x206   :  { %v1697_v43 = vmax.f32 %v2876_v39, 0.0  ;;  %2147 = vmatpush1.bf16.msra.mxu0 %v3281_v35  ;;  %v3339_v35 = vld [vmem:[#allocation10] sm:$0xff]   ;;  %v3346_v39 = vld [vmem:[#allocation10 + $0x38] sm:$0xff]  }
 0x207   :  { %v1698_v46 = vmax.f32 %v2877_v41, 0.0  ;;  %2148 = vmatprep.subr.bf16.mxu0 %v3286_v38  ;;  %v3345_v38 = vld [vmem:[#allocation10 + $0x30] sm:$0xff]   ;;  %v2780_v41 = vld [vmem:[%s3684_s6] ss:$0 sm:$0xff]  ;;  %s2497_s6 = sshll.u32 %s3504_s17, 4  ;;  %s2498_s6 = int_to_ptr.vmem [resolvable:$true] %s2497_s6 }
 0x208   :  { %v1701_v48 = vpack.c.bf16 %v1697_v43, %v1693_v42  ;;  %s3458_s18 = scalar_lea.vmem %s2498_s6, 128  ;;  %p3463_p13 = scmp.lt.s32.totalorder %s2498_s6, %s2498_s6 }
 0x209   :  { %v1702_v49 = vpack.c.bf16 %v1698_v46, %v1694_v45  ;;  %p3459_p12 = scmp.ne.s32.totalorder %s2498_s6, %s3458_s18  ;;  %p3464_p0 = scmp.lt.s32.totalorder %s3458_s18, %s3458_s18 }
 0x20a   :  { %2149 = vmatpush1.bf16.msra.mxu0 %v3284_v44 }
 0x20b   :  { %2174 = vmatprep.mubr.bf16.mxu0 %v1702_v49  ;;  %2150 = vmatprep.subr.bf16.mxu0 %v3289_v47  ;;  %p3465_p1 = por %p3464_p0, %p3463_p13 }
 0x20d   :  { %p3466_p2 = pnand %p3465_p1, %p3459_p12 }
 0x20e   :  { %2151 = vmatpush1.bf16.msra.mxu0 %v3287_v50 }
 0x20f   :  { %2152 = vmatprep.subr.bf16.mxu0 %v3292_v51 }
 0x212   :  { %2153 = vmatpush1.bf16.msra.mxu0 %v3290_v52  ;;  %v2797_v52 = vld [vmem:[%s3686_s8] ss:$0 sm:$0xff] }
 0x213   :  { %2154 = vmatprep.subr.bf16.mxu0 %v3295_v53 }
 0x216   :  { %2155 = vmatpush1.bf16.msra.mxu0 %v3293_v54 }
 0x217   :  { %2156 = vmatprep.subr.bf16.mxu0 %v3298_v55 }
 0x21a   :  { %2157 = vmatpush1.bf16.msra.mxu0 %v3296_v56 }
 0x21b   :  { %2158 = vmatprep.subr.bf16.mxu0 %v3301_v57 }
 0x21e   :  { %2159 = vmatpush1.bf16.msra.mxu0 %v3299_v58 }
 0x21f   :  { %2160 = vmatprep.subr.bf16.mxu0 %v3304_v59 }
 0x222   :  { %2161 = vmatpush1.bf16.msra.mxu0 %v3302_v60 }
 0x223   :  { %2162 = vmatprep.subr.bf16.mxu0 %v3307_v61 }
 0x226   :  { %2163 = vmatpush1.bf16.msra.mxu0 %v3305_v62 }
 0x227   :  { %2164 = vmatprep.subr.bf16.mxu0 %v3310_v63 }
 0x22a   :  { %2165 = vmatpush1.bf16.msra.mxu0 %v3308_v3 }
 0x22b   :  { %2166 = vmatprep.subr.bf16.mxu0 %v3313_v5 }
 0x22e   :  { %2167 = vmatpush1.bf16.msra.mxu0 %v3311_v6 }
 0x22f   :  { %2168 = vmatprep.subr.bf16.mxu0 %v3316_v7 }
 0x232   :  { %2169 = vmatpush1.bf16.msra.mxu0 %v3314_v8 }
 0x233   :  { %2170 = vmatprep.subr.bf16.mxu0 %v3319_v9 }
 0x236   :  { %2171 = vmatpush1.bf16.msra.mxu0 %v3317_v10 }
 0x237   :  { %2172 = vmatprep.subr.bf16.mxu0 %v3322_v11 }
 0x23a   :  { %2173 = vmatpush1.bf16.msra.mxu0 %v3320_v12 }
 0x23d   :  { %2175 = vmatmul.mubr.bf16.vlgmr.msra.gmra.mrb[4].mxu0 %v1701_v48 }
 0x310   :  { %v2176_v22 = vpop.f32.mrb[4].mxu0 }
 0x311   :  { %v2878_v23 = vadd.f32 %v2176_v22, %v1772_v20  ;;  %v2178_v24 = vpop.f32.mrb[5].mxu0 }
 0x312   :  { %v2879_v25 = vadd.f32 %v2178_v24, %v1776_v21  ;;  %v2180_v26 = vpop.f32.mrb[6].mxu0 }
 0x313   :  { %v2880_v27 = vadd.f32 %v2180_v26, %v1772_v20  ;;  %v2182_v28 = vpop.f32.mrb[7].mxu0  ;;  %v2185_v0 = vmax.f32 %v2878_v23, 0.0 }
 0x314   :  { %v2881_v29 = vadd.f32 %v2182_v28, %v1776_v21  ;;  %v2186_v31 = vmax.f32 %v2879_v25, 0.0 }
 0x315   :  { %v2187_v30 = vmax.f32 %v2880_v27, 0.0 }
 0x316   :  { %v2188_v32 = vmax.f32 %v2881_v29, 0.0 }
 0x317   :  { %v2189_v33 = vpack.c.bf16 %v2187_v30, %v2185_v0 }
 0x318   :  { %v2190_v34 = vpack.c.bf16 %v2188_v32, %v2186_v31 }
 0x31a   :  { %2358 = vmatprep.mubr.bf16.mxu1 %v2190_v34 }
 0x31b   :  { %2359 = vmatmul.mubr.bf16.vlgmr.msra.gmra.mrb[8].mxu1 %v2189_v33 }
 0x31c   :  { %2847 = vmatpush3.bf16.msra.mxu1 %v3339_v35  ;;  %2862 = vmatprep.mubr.msk.bf16.mxu1 %vm3503_vm1, %v3502_v18 }
 0x31d   :  { %2848 = vmatprep.subr.bf16.mxu1 %v3502_v18 }
 0x320   :  { %2849 = vmatpush3.bf16.msra.mxu1 %v3340_v1 }
 0x321   :  { %2850 = vmatprep.subr.bf16.mxu1 %v3502_v18 }
 0x324   :  { %2851 = vmatpush3.bf16.msra.mxu1 %v3341_v2 }
 0x325   :  { %2852 = vmatprep.subr.bf16.mxu1 %v3502_v18 }
 0x328   :  { %2853 = vmatpush3.bf16.msra.mxu1 %v3342_v4 }
 0x329   :  { %2854 = vmatprep.subr.bf16.mxu1 %v3502_v18 }
 0x32c   :  { %2855 = vmatpush3.bf16.msra.mxu1 %v3343_v36 }
 0x32d   :  { %2856 = vmatprep.subr.bf16.mxu1 %v3502_v18 }
 0x330   :  { %2857 = vmatpush3.bf16.msra.mxu1 %v3344_v37 }
 0x331   :  { %2858 = vmatprep.subr.bf16.mxu1 %v3502_v18 }
 0x334   :  { %2859 = vmatpush3.bf16.msra.mxu1 %v3345_v38 }
 0x335   :  { %2860 = vmatprep.subr.bf16.mxu1 %v3502_v18 }
 0x338   :  { %2861 = vmatpush3.bf16.msra.mxu1 %v3346_v39 }
 0x3ee   :  { %v2831_v40 = vpop.f32.mrb[8].mxu1 }
 0x3ef   :  { %v2832_v42 = vpop.f32.mrb[9].mxu1 }
 0x3f0   :  { %v2833_v43 = vadd.f32 %v2832_v42, %v2831_v40  ;;  %v2834_v44 = vpop.f32.mrb[10].mxu1 }
 0x3f1   :  { %v2835_v45 = vpop.f32.mrb[11].mxu1 }
 0x3f2   :  { %v2361_v46 = vadd.f32 %v2833_v43, %v2780_v41  ;;  %v2836_v47 = vadd.f32 %v2835_v45, %v2834_v44 }
 0x3f4   :  { %v2364_v48 = vadd.f32 %v2836_v47, %v2780_v41  ;;  %v2367_v49 = vmax.f32 %v2361_v46, 0.0 }
 0x3f6   :  { %v2368_v50 = vmax.f32 %v2364_v48, 0.0 }
 0x3f8   :  { %v2369_v51 = vpack.c.bf16 %v2368_v50, %v2367_v49 }
 0x3fa   :  { %2863 = vmatmul.mubr.bf16.vlgmr.msra.gmra.mrb[12].mxu1 %v2369_v51 }
 0x4cd   :  { %v2475_v53 = vpop.f32.mrb[12].mxu1 }
 0x4ce   :  { %v2864_v54 = vpop.f32.mrb[13].mxu1  ;;  %v2476_v56 = vadd.f32 %v2797_v52, %v2475_v53 }
 0x4cf   :  { %v2478_v55 = vpop.f32.mrb[14].mxu1 }
 0x4d0   :  { %v2479_v57 = vadd.f32 %v2797_v52, %v2478_v55  ;;  %v2865_v58 = vpop.f32.mrb[15].mxu1 }
 0x4d2   :  { %v2813_v59 = vpack.c.bf16 %v2479_v57, %v2476_v56 }
 0x4d4   :  { %2814 = vst [vmem:[#allocation11] sm:$0xff] %v2813_v59  }
 0x4d5   :  { %3469 = shalt.err (!%p3466_p2)
}
 0x4d6   :  { %s3470_s16 = scalar_lea.hbm %s3687_s9, 128 }
 0x4d7   :  { %p3471_p3 = scmp.ne.s32.totalorder %s3687_s9, %s3470_s16  ;;  %p3474_p4 = scmp.lt.u32.totalorder %s3470_s16, %s3687_s9 }
 0x4d9   :  { %p3476_p5 = pnand %p3474_p4, %p3471_p3 }
 0x4db   :  { %3479 = shalt.err (!%p3476_p5)
}
 0x4dc   :  { %2503 = dma.vmem_to_hbm [thread:$0]  %s2498_s6, 128, %s3687_s9, [#allocation4], %s3492_s1, %s3492_s1, %s3493_s10  }
 0x4dd   :  { %3486 = dma.done.wait [#allocation4], 128  }
 0x4de   :  { %3487 = vsyncadd [#allocation4], 4294967168 }
 0x4df   :  { %2507 = vsyncpa [#allocation3], 1 }
 0x4e0   :  { %2508 = vsyncpa [#allocation6], 1 }
 0x4e1   :  { %2509 = vsyncpa [#allocation9], 1 }
 0x4e2   :  { %2510 = vsyncpa [#allocation4], 1 }

</bundles_post_ra>
